<compile_context>
chip_gen: v7x
topology: tpu7x:2x2x1
jax: 0.10.0
libtpu: 0.0.40
codegen_flags: <defaults>
</compile_context>

<pallas_src>
import math
import functools

import jax
import jax.numpy as jnp
from jax.experimental import pallas as pl
from jax.experimental.pallas import tpu as pltpu


def _mha_kernel(x_ref, wqkv_ref, bqkv_ref, wo_ref, bo_ref, *refs,
                n_heads, seq_len, block_batch, need_weights):
    if need_weights:
        out_ref, attn_ref, qkv_scr, ho_scr = refs
    else:
        out_ref, qkv_scr, ho_scr = refs
        attn_ref = None

    E = x_ref.shape[-1]
    D = E // n_heads
    Bt, L = block_batch, seq_len
    M = Bt * L

    # ---- Fused QKV projection: one (M,E)@(E,3E) MXU matmul (scale folded into Q). ----
    x = x_ref[...].astype(jnp.bfloat16)                                   # (M, E)
    qkv = jnp.dot(x, wqkv_ref[...], preferred_element_type=jnp.float32)   # (M, 3E) f32
    qkv = qkv + bqkv_ref[...]
    # Park qkv in VMEM scratch (bounds its live range); L % 8 == 0 keeps this
    # leading-dim split a free, tile-aligned reshape for f32.
    qkv_scr[...] = qkv.reshape(Bt, L, 3 * E)

    for h in range(n_heads):   # static unroll; per-head state flows through VMEM scratch
        q_h = qkv_scr[:, :, h * D:(h + 1) * D].astype(jnp.bfloat16)           # (Bt,L,D)
        k_h = qkv_scr[:, :, E + h * D:E + (h + 1) * D].astype(jnp.bfloat16)
        v_h = qkv_scr[:, :, 2 * E + h * D:2 * E + (h + 1) * D].astype(jnp.bfloat16)

        # Scores, batched over the block's batch dim (batch leading -> no transposes).
        s = jnp.einsum('bqd,bkd->bqk', q_h, k_h,
                       preferred_element_type=jnp.float32)                # (Bt,L,L) f32
        s = s - jnp.max(s, axis=-1, keepdims=True)
        p = jnp.exp(s)
        denom = jnp.sum(p, axis=-1, keepdims=True)
        if need_weights:
            # Exact reciprocal: these probabilities are returned to the caller.
            p = p * (1.0 / denom)
        else:
            p = p * pl.reciprocal(denom, approx=True)                     # EUP slot

        if need_weights:
            if h == 0:
                attn_ref[...] = p
            else:
                attn_ref[...] += p

        oh = jnp.einsum('bqk,bkd->bqd', p.astype(jnp.bfloat16), v_h,
                        preferred_element_type=jnp.float32)               # (Bt,L,D) f32
        # Assemble the concatenated-heads slab (lane offset h*D) for one big out-proj.
        ho_scr[:, :, h * D:(h + 1) * D] = oh

    if need_weights:
        # PyTorch default average_attn_weights=True -> mean over heads.
        attn_ref[...] *= (1.0 / n_heads)

    # ---- Single output projection with contraction depth K = E. ----
    ho = ho_scr[...].reshape(M, E).astype(jnp.bfloat16)
    out = jnp.dot(ho, wo_ref[...], preferred_element_type=jnp.float32) + bo_ref[...]
    out_ref[...] = out.astype(out_ref.dtype)


def _num_tensorcores_per_chip():
    """Best-effort TensorCore count per chip (perf heuristic only)."""
    try:
        kind = jax.devices()[0].device_kind.lower()
    except Exception:
        return 1
    return 2 if ("v7" in kind or "7x" in kind) else 1


def _vmem_limit_bytes():
    try:
        cap = int(pltpu.get_tpu_info().vmem_capacity_bytes)
        return max(32 << 20, min(cap - (16 << 20), 112 << 20))
    except Exception:
        return 48 << 20   # safe on all generations (v7x physical VMEM is 64 MiB)


def _choose_block_batch(B, L, E, *, num_tc):
    """Pick a divisor of B. Single-TC (v5e/v6e): big blocks (~512 rows/step).
    Dual-TC (v7x): keep >= 2 parallel grid steps so both TensorCores get work."""
    row_target = 512 if num_tc == 1 else 256
    bt_cap = max(1, row_target // max(L, 1))
    if num_tc >= 2 and B >= 2:
        bt_cap = min(bt_cap, B // 2)
    bt_cap = max(1, min(bt_cap, B))
    budget = 40 << 20     # rough per-step VMEM budget (excluding resident weights)
    best = 1
    for d in range(1, bt_cap + 1):
        if B % d != 0:
            continue
        M = d * L
        step_bytes = (2 * 2 * (M * E * 4)           # x + out blocks, double buffered
                      + 2 * (d * L * L * 4)         # attn block
                      + M * 3 * E * 4 + M * E * 4)  # qkv / head-out scratch (f32)
        if step_bytes <= budget:
            best = d
    return best


def _pack_params(params, n_heads, embed_dim):
    """One-time packing: fuse QKV, fold softmax scale into Q, cast matmul weights
    to bf16. Output-projection weight kept as a plain (E, E) matrix."""
    wq_t, wk_t, wv_t, bq, bk, bv, wo_t, bo = params
    D = embed_dim // n_heads
    scale = 1.0 / math.sqrt(D)
    w_qkv = jnp.concatenate([wq_t * scale, wk_t, wv_t], axis=1).astype(jnp.bfloat16)
    b_qkv = jnp.concatenate([bq[0] * scale, bk[0], bv[0]],
                            axis=0).reshape(1, -1).astype(jnp.float32)
    wo = wo_t.astype(jnp.bfloat16)                      # (E, E)
    return w_qkv, b_qkv, wo, bo.astype(jnp.float32)


def segment_self_attention(x, params, n_heads, *, need_weights=True, block_batch=None):
    """x: (B, L, E). Returns (out, attn_weights) if need_weights else out."""
    B, L, E = x.shape
    assert E % n_heads == 0, "embed_dim must be divisible by n_heads"
    assert L % 8 == 0, "segment length must be a multiple of 8 (pad L externally)"
    D = E // n_heads

    w_qkv, b_qkv, wo, bo = _pack_params(params, n_heads, E)

    num_tc = _num_tensorcores_per_chip()
    if block_batch is None:
        block_batch = _choose_block_batch(B, L, E, num_tc=num_tc)
    assert B % block_batch == 0, "block_batch must divide B"
    Bt = block_batch
    M = Bt * L
    grid = (B // Bt,)

    x2d = x.reshape(B * L, E)          # lane/sublane-dense 2-D view (free metadata op)
    out_dtype = x.dtype                # stream output in the caller's dtype

    kernel = functools.partial(_mha_kernel, n_heads=n_heads, seq_len=L,
                               block_batch=Bt, need_weights=need_weights)

    # Single-buffer the resident weights once their double-buffered footprint matters
    # (keeps large-E configs inside v7x's 64 MiB VMEM); plain specs when small.
    weight_bytes = (E * 3 * E + E * E) * 2
    single_buffer_weights = 2 * weight_bytes > (16 << 20)

    def _const_spec(shape):
        ndim = len(shape)

        def idx(i, _n=ndim):
            return (0,) * _n

        if single_buffer_weights:
            return pl.BlockSpec(shape, idx, pipeline_mode=pl.Buffered(1))
        return pl.BlockSpec(shape, idx)

    in_specs = [
        pl.BlockSpec((M, E), lambda i: (i, 0)),          # x block (streamed)
        _const_spec((E, 3 * E)),                         # fused QKV weight (bf16)
        _const_spec((1, 3 * E)),                         # fused QKV bias (f32)
        _const_spec((E, E)),                             # out-proj weight (bf16)
        _const_spec((1, E)),                             # out-proj bias (f32)
    ]
    out_shapes = [jax.ShapeDtypeStruct((B * L, E), out_dtype)]
    out_specs = [pl.BlockSpec((M, E), lambda i: (i, 0))]
    if need_weights:
        out_shapes.append(jax.ShapeDtypeStruct((B, L, L), jnp.float32))
        out_specs.append(pl.BlockSpec((Bt, L, L), lambda i: (i, 0, 0)))

    scratch_shapes = [
        pltpu.VMEM((Bt, L, 3 * E), jnp.float32),   # fused QKV (per-head static slices)
        pltpu.VMEM((Bt, L, E), jnp.float32),       # concatenated head outputs
    ]

    flops = 2 * B * L * E * 3 * E + 4 * B * n_heads * L * L * D + 2 * B * L * E * E
    bytes_accessed = (B * L * E * x.dtype.itemsize
                      + B * L * E * jnp.dtype(out_dtype).itemsize
                      + (B * L * L * 4 if need_weights else 0)
                      + weight_bytes + (3 * E + E) * 4)
    cost = pl.CostEstimate(flops=int(flops),
                           transcendentals=int(B * n_heads * L * L),
                           bytes_accessed=int(bytes_accessed))

    # TODO(synk): for very large E (>= ~1536) additionally tile the 3E axis of the QKV
    # weight with an extra grid dimension instead of keeping it fully resident.
    results = pl.pallas_call(
        kernel,
        out_shape=tuple(out_shapes),
        grid_spec=pltpu.PrefetchScalarGridSpec(
            num_scalar_prefetch=0,
            grid=grid,
            in_specs=in_specs,
            out_specs=tuple(out_specs),
            scratch_shapes=scratch_shapes,
        ),
        compiler_params=pltpu.CompilerParams(
            dimension_semantics=("parallel",),
            vmem_limit_bytes=_vmem_limit_bytes(),
        ),
        cost_estimate=cost,
    )(x2d, w_qkv, b_qkv, wo, bo)

    if need_weights:
        out2d, attn = results
        return out2d.reshape(B, L, E), attn
    out2d = results[0] if isinstance(results, (tuple, list)) else results
    return out2d.reshape(B, L, E)


def init_params(key, embed_dim):
    """Deterministic synthetic init mirroring nn.MultiheadAttention shapes:
       in_proj_weight (3E, E), in_proj_bias (3E,), out_proj (E, E) + (E,)."""
    k1, k2, k3, k4 = jax.random.split(key, 4)
    bound = 1.0 / math.sqrt(embed_dim)
    in_proj_w = jax.random.uniform(k1, (3 * embed_dim, embed_dim),
                                   jnp.float32, -bound, bound)
    in_proj_b = jax.random.uniform(k2, (3 * embed_dim,),
                                   jnp.float32, -bound, bound)
    out_w = jax.random.uniform(k3, (embed_dim, embed_dim),
                               jnp.float32, -bound, bound)
    out_b = jax.random.uniform(k4, (embed_dim,), jnp.float32, -bound, bound)

    wq, wk, wv = jnp.split(in_proj_w, 3, axis=0)     # each (E, E)
    bq, bk, bv = jnp.split(in_proj_b, 3, axis=0)     # each (E,)
    # Pre-transpose so kernel computes x @ W_t ( == x @ W.T in PyTorch Linear).
    return (wq.T, wk.T, wv.T,
            bq.reshape(1, -1), bk.reshape(1, -1), bv.reshape(1, -1),
            out_w.T, out_b.reshape(1, -1))


def _reference(x, params, n_heads):
    # pure-JAX f32 reference of PyTorch MultiheadAttention forward (dropout=0).
    wq_t, wk_t, wv_t, bq, bk, bv, wo_t, bo = params
    B, L, E = x.shape
    D = E // n_heads
    q = x @ wq_t + bq[0]
    k = x @ wk_t + bk[0]
    v = x @ wv_t + bv[0]
    q = q.reshape(B, L, n_heads, D).transpose(0, 2, 1, 3) / math.sqrt(D)
    k = k.reshape(B, L, n_heads, D).transpose(0, 2, 1, 3)
    v = v.reshape(B, L, n_heads, D).transpose(0, 2, 1, 3)
    s = jnp.einsum("bhqd,bhkd->bhqk", q, k)
    p = jax.nn.softmax(s, axis=-1)
    o = jnp.einsum("bhqk,bhkd->bhqd", p, v)
    o = o.transpose(0, 2, 1, 3).reshape(B, L, E)
    out = o @ wo_t + bo[0]
    return out, p.mean(axis=1)


if __name__ == "__main__":
    B, L, E, H = 4, 8, 32, 4
    key = jax.random.PRNGKey(0)
    kx, kp = jax.random.split(key)
    x = jax.random.normal(kx, (B, L, E), dtype=jnp.float32)
    params = init_params(kp, E)

    out, attn = segment_self_attention(x, params, H, need_weights=True)
    out = jax.block_until_ready(out)
    attn = jax.block_until_ready(attn)

    ref_out, ref_attn = _reference(x, params, H)
    assert out.shape == (B, L, E) and attn.shape == (B, L, L)
    # bf16 matmul operands (f32 accumulation) -> loosened tolerance vs f32 reference.
    assert jnp.allclose(out, ref_out, atol=3e-2, rtol=3e-2), \
        float(jnp.max(jnp.abs(out - ref_out)))
    assert jnp.allclose(attn, ref_attn, atol=3e-2, rtol=3e-2), \
        float(jnp.max(jnp.abs(attn - ref_attn)))

    # Fast path without the attention-weights output.
    out2 = segment_self_attention(x, params, H, need_weights=False)
    out2 = jax.block_until_ready(out2)
    assert jnp.allclose(out2, ref_out, atol=3e-2, rtol=3e-2)

    print("KERNEL_OK")
</pallas_src>

<mosaic_0001>
module attributes {stable_mosaic.version = 11 : i64} {
  func.func @_mha_kernel(%arg0: i32, %arg1: memref<32x32xf32, #tpu.memory_space<vmem>>, %arg2: memref<32x96xbf16, #tpu.memory_space<vmem>>, %arg3: memref<1x96xf32, #tpu.memory_space<vmem>>, %arg4: memref<32x32xbf16, #tpu.memory_space<vmem>>, %arg5: memref<1x32xf32, #tpu.memory_space<vmem>>, %arg6: memref<32x32xf32, #tpu.memory_space<vmem>>, %arg7: memref<4x8x8xf32, #tpu.memory_space<vmem>>, %arg8: memref<4x8x96xf32, #tpu.memory_space<vmem>>, %arg9: memref<4x8x32xf32, #tpu.memory_space<vmem>>) attributes {dimension_semantics = [#tpu.dimension_semantics<parallel>], iteration_bounds = array<i64: 1>, scalar_prefetch = 0 : i64, scratch_operands = 2 : i64, tpu.core_type = #tpu.core_type<tc>, window_params = [{transform_indices = @transform_0, window_bounds = array<i64: 32, 32>}, {pipeline_mode = #tpu.pipeline_mode<synchronous>, transform_indices = @transform_1, window_bounds = array<i64: 32, 96>}, {pipeline_mode = #tpu.pipeline_mode<synchronous>, transform_indices = @transform_2, window_bounds = array<i64: 1, 96>}, {pipeline_mode = #tpu.pipeline_mode<synchronous>, transform_indices = @transform_3, window_bounds = array<i64: 32, 32>}, {pipeline_mode = #tpu.pipeline_mode<synchronous>, transform_indices = @transform_4, window_bounds = array<i64: 1, 32>}, {transform_indices = @transform_5, window_bounds = array<i64: 32, 32>}, {transform_indices = @transform_6, window_bounds = array<i64: 4, 8, 8>}]} {
    %c0 = arith.constant 0 : index
    %c0_0 = arith.constant 0 : index
    %0 = vector.load %arg1[%c0, %c0_0] : memref<32x32xf32, #tpu.memory_space<vmem>>, vector<32x32xf32>
    %1 = arith.truncf %0 : vector<32x32xf32> to vector<32x32xbf16>
    %c0_1 = arith.constant 0 : index
    %c0_2 = arith.constant 0 : index
    %2 = vector.load %arg2[%c0_1, %c0_2] : memref<32x96xbf16, #tpu.memory_space<vmem>>, vector<32x96xbf16>
    %cst = arith.constant dense<0.000000e+00> : vector<32x96xf32>
    %3 = tpu.matmul %1, %2, %cst {dimension_numbers = #tpu.dot_dimension_numbers<[1], [0], [0], [1], [0, 0, 1, 1], [], []>} : vector<32x32xbf16>, vector<32x96xbf16>, vector<32x96xf32> -> vector<32x96xf32>
    %c0_3 = arith.constant 0 : index
    %c0_4 = arith.constant 0 : index
    %4 = vector.load %arg3[%c0_3, %c0_4] : memref<1x96xf32, #tpu.memory_space<vmem>>, vector<1x96xf32>
    %5 = vector.broadcast %4 : vector<1x96xf32> to vector<32x96xf32>
    %6 = arith.addf %3, %5 : vector<32x96xf32>
    %7 = vector.shape_cast %6 : vector<32x96xf32> to vector<4x8x96xf32>
    %c0_5 = arith.constant 0 : index
    %c0_6 = arith.constant 0 : index
    %c0_7 = arith.constant 0 : index
    %8 = vector.load %arg8[%c0_5, %c0_6, %c0_7] : memref<4x8x96xf32, #tpu.memory_space<vmem>>, vector<4x8x96xf32>
    tpu.vector_store %arg8[%c0_5, %c0_6, %c0_7], %7 {strides = array<i32>} : memref<4x8x96xf32, #tpu.memory_space<vmem>>, vector<4x8x96xf32>,
    %c0_8 = arith.constant 0 : index
    %c0_9 = arith.constant 0 : index
    %c0_10 = arith.constant 0 : index
    %9 = vector.load %arg8[%c0_8, %c0_9, %c0_10] : memref<4x8x96xf32, #tpu.memory_space<vmem>>, vector<4x8x8xf32>
    %10 = arith.truncf %9 : vector<4x8x8xf32> to vector<4x8x8xbf16>
    %c0_11 = arith.constant 0 : index
    %c0_12 = arith.constant 0 : index
    %c32 = arith.constant 32 : index
    %11 = vector.load %arg8[%c0_11, %c0_12, %c32] : memref<4x8x96xf32, #tpu.memory_space<vmem>>, vector<4x8x8xf32>
    %12 = arith.truncf %11 : vector<4x8x8xf32> to vector<4x8x8xbf16>
    %c0_13 = arith.constant 0 : index
    %c0_14 = arith.constant 0 : index
    %c64 = arith.constant 64 : index
    %13 = vector.load %arg8[%c0_13, %c0_14, %c64] : memref<4x8x96xf32, #tpu.memory_space<vmem>>, vector<4x8x8xf32>
    %14 = arith.truncf %13 : vector<4x8x8xf32> to vector<4x8x8xbf16>
    "tpu.trace_start"() <{level = 10 : i32, message = "bqd,bkd->bqk"}> : () -> ()
    %cst_15 = arith.constant dense<0.000000e+00> : vector<4x8x8xf32>
    %15 = tpu.matmul %10, %12, %cst_15 {dimension_numbers = #tpu.dot_dimension_numbers<[2], [2], [1], [1], [0, 0, 0, 1, 1, 1], [0], [0]>} : vector<4x8x8xbf16>, vector<4x8x8xbf16>, vector<4x8x8xf32> -> vector<4x8x8xf32>
    "tpu.trace_stop"() : () -> ()
    %cst_16 = arith.constant dense<0xFF800000> : vector<4x8xf32>
    %16 = vector.multi_reduction <maximumf>, %15, %cst_16 [2] : vector<4x8x8xf32> to vector<4x8xf32>
    %17 = vector.shape_cast %16 : vector<4x8xf32> to vector<4x8x1xf32>
    %18 = vector.broadcast %17 : vector<4x8x1xf32> to vector<4x8x8xf32>
    %19 = arith.subf %15, %18 : vector<4x8x8xf32>
    %20 = math.exp %19 : vector<4x8x8xf32>
    %cst_17 = arith.constant dense<0.000000e+00> : vector<4x8xf32>
    %21 = vector.multi_reduction <add>, %20, %cst_17 [2] : vector<4x8x8xf32> to vector<4x8xf32>
    %22 = vector.shape_cast %21 : vector<4x8xf32> to vector<4x8x1xf32>
    %cst_18 = arith.constant 1.000000e+00 : f32
    %23 = vector.broadcast %cst_18 : f32 to vector<4x8x1xf32>
    %24 = arith.divf %23, %22 : vector<4x8x1xf32>
    %25 = vector.broadcast %24 : vector<4x8x1xf32> to vector<4x8x8xf32>
    %26 = arith.mulf %20, %25 : vector<4x8x8xf32>
    %c0_19 = arith.constant 0 : index
    %c0_20 = arith.constant 0 : index
    %c0_21 = arith.constant 0 : index
    %27 = vector.load %arg7[%c0_19, %c0_20, %c0_21] : memref<4x8x8xf32, #tpu.memory_space<vmem>>, vector<4x8x8xf32>
    tpu.vector_store %arg7[%c0_19, %c0_20, %c0_21], %26 {strides = array<i32>} : memref<4x8x8xf32, #tpu.memory_space<vmem>>, vector<4x8x8xf32>,
    %28 = arith.truncf %26 : vector<4x8x8xf32> to vector<4x8x8xbf16>
    "tpu.trace_start"() <{level = 10 : i32, message = "bqk,bkd->bqd"}> : () -> ()
    %cst_22 = arith.constant dense<0.000000e+00> : vector<4x8x8xf32>
    %29 = tpu.matmul %28, %14, %cst_22 {dimension_numbers = #tpu.dot_dimension_numbers<[2], [1], [1], [2], [0, 0, 0, 1, 1, 2], [0], [0]>} : vector<4x8x8xbf16>, vector<4x8x8xbf16>, vector<4x8x8xf32> -> vector<4x8x8xf32>
    "tpu.trace_stop"() : () -> ()
    %c0_23 = arith.constant 0 : index
    %c0_24 = arith.constant 0 : index
    %c0_25 = arith.constant 0 : index
    %30 = vector.load %arg9[%c0_23, %c0_24, %c0_25] : memref<4x8x32xf32, #tpu.memory_space<vmem>>, vector<4x8x8xf32>
    tpu.vector_store %arg9[%c0_23, %c0_24, %c0_25], %29 {strides = array<i32>} : memref<4x8x32xf32, #tpu.memory_space<vmem>>, vector<4x8x8xf32>,
    %c0_26 = arith.constant 0 : index
    %c0_27 = arith.constant 0 : index
    %c8 = arith.constant 8 : index
    %31 = vector.load %arg8[%c0_26, %c0_27, %c8] : memref<4x8x96xf32, #tpu.memory_space<vmem>>, vector<4x8x8xf32>
    %32 = arith.truncf %31 : vector<4x8x8xf32> to vector<4x8x8xbf16>
    %c0_28 = arith.constant 0 : index
    %c0_29 = arith.constant 0 : index
    %c40 = arith.constant 40 : index
    %33 = vector.load %arg8[%c0_28, %c0_29, %c40] : memref<4x8x96xf32, #tpu.memory_space<vmem>>, vector<4x8x8xf32>
    %34 = arith.truncf %33 : vector<4x8x8xf32> to vector<4x8x8xbf16>
    %c0_30 = arith.constant 0 : index
    %c0_31 = arith.constant 0 : index
    %c72 = arith.constant 72 : index
    %35 = vector.load %arg8[%c0_30, %c0_31, %c72] : memref<4x8x96xf32, #tpu.memory_space<vmem>>, vector<4x8x8xf32>
    %36 = arith.truncf %35 : vector<4x8x8xf32> to vector<4x8x8xbf16>
    "tpu.trace_start"() <{level = 10 : i32, message = "bqd,bkd->bqk"}> : () -> ()
    %cst_32 = arith.constant dense<0.000000e+00> : vector<4x8x8xf32>
    %37 = tpu.matmul %32, %34, %cst_32 {dimension_numbers = #tpu.dot_dimension_numbers<[2], [2], [1], [1], [0, 0, 0, 1, 1, 1], [0], [0]>} : vector<4x8x8xbf16>, vector<4x8x8xbf16>, vector<4x8x8xf32> -> vector<4x8x8xf32>
    "tpu.trace_stop"() : () -> ()
    %cst_33 = arith.constant dense<0xFF800000> : vector<4x8xf32>
    %38 = vector.multi_reduction <maximumf>, %37, %cst_33 [2] : vector<4x8x8xf32> to vector<4x8xf32>
    %39 = vector.shape_cast %38 : vector<4x8xf32> to vector<4x8x1xf32>
    %40 = vector.broadcast %39 : vector<4x8x1xf32> to vector<4x8x8xf32>
    %41 = arith.subf %37, %40 : vector<4x8x8xf32>
    %42 = math.exp %41 : vector<4x8x8xf32>
    %cst_34 = arith.constant dense<0.000000e+00> : vector<4x8xf32>
    %43 = vector.multi_reduction <add>, %42, %cst_34 [2] : vector<4x8x8xf32> to vector<4x8xf32>
    %44 = vector.shape_cast %43 : vector<4x8xf32> to vector<4x8x1xf32>
    %cst_35 = arith.constant 1.000000e+00 : f32
    %45 = vector.broadcast %cst_35 : f32 to vector<4x8x1xf32>
    %46 = arith.divf %45, %44 : vector<4x8x1xf32>
    %47 = vector.broadcast %46 : vector<4x8x1xf32> to vector<4x8x8xf32>
    %48 = arith.mulf %42, %47 : vector<4x8x8xf32>
    %c0_36 = arith.constant 0 : index
    %c0_37 = arith.constant 0 : index
    %c0_38 = arith.constant 0 : index
    %49 = vector.load %arg7[%c0_36, %c0_37, %c0_38] : memref<4x8x8xf32, #tpu.memory_space<vmem>>, vector<4x8x8xf32>
    %50 = arith.addf %49, %48 : vector<4x8x8xf32>
    %c0_39 = arith.constant 0 : index
    %c0_40 = arith.constant 0 : index
    %c0_41 = arith.constant 0 : index
    %51 = vector.load %arg7[%c0_39, %c0_40, %c0_41] : memref<4x8x8xf32, #tpu.memory_space<vmem>>, vector<4x8x8xf32>
    tpu.vector_store %arg7[%c0_39, %c0_40, %c0_41], %50 {strides = array<i32>} : memref<4x8x8xf32, #tpu.memory_space<vmem>>, vector<4x8x8xf32>,
    %52 = arith.truncf %48 : vector<4x8x8xf32> to vector<4x8x8xbf16>
    "tpu.trace_start"() <{level = 10 : i32, message = "bqk,bkd->bqd"}> : () -> ()
    %cst_42 = arith.constant dense<0.000000e+00> : vector<4x8x8xf32>
    %53 = tpu.matmul %52, %36, %cst_42 {dimension_numbers = #tpu.dot_dimension_numbers<[2], [1], [1], [2], [0, 0, 0, 1, 1, 2], [0], [0]>} : vector<4x8x8xbf16>, vector<4x8x8xbf16>, vector<4x8x8xf32> -> vector<4x8x8xf32>
    "tpu.trace_stop"() : () -> ()
    %c0_43 = arith.constant 0 : index
    %c0_44 = arith.constant 0 : index
    %c8_45 = arith.constant 8 : index
    %54 = vector.load %arg9[%c0_43, %c0_44, %c8_45] : memref<4x8x32xf32, #tpu.memory_space<vmem>>, vector<4x8x8xf32>
    tpu.vector_store %arg9[%c0_43, %c0_44, %c8_45], %53 {strides = array<i32>} : memref<4x8x32xf32, #tpu.memory_space<vmem>>, vector<4x8x8xf32>,
    %c0_46 = arith.constant 0 : index
    %c0_47 = arith.constant 0 : index
    %c16 = arith.constant 16 : index
    %55 = vector.load %arg8[%c0_46, %c0_47, %c16] : memref<4x8x96xf32, #tpu.memory_space<vmem>>, vector<4x8x8xf32>
    %56 = arith.truncf %55 : vector<4x8x8xf32> to vector<4x8x8xbf16>
    %c0_48 = arith.constant 0 : index
    %c0_49 = arith.constant 0 : index
    %c48 = arith.constant 48 : index
    %57 = vector.load %arg8[%c0_48, %c0_49, %c48] : memref<4x8x96xf32, #tpu.memory_space<vmem>>, vector<4x8x8xf32>
    %58 = arith.truncf %57 : vector<4x8x8xf32> to vector<4x8x8xbf16>
    %c0_50 = arith.constant 0 : index
    %c0_51 = arith.constant 0 : index
    %c80 = arith.constant 80 : index
    %59 = vector.load %arg8[%c0_50, %c0_51, %c80] : memref<4x8x96xf32, #tpu.memory_space<vmem>>, vector<4x8x8xf32>
    %60 = arith.truncf %59 : vector<4x8x8xf32> to vector<4x8x8xbf16>
    "tpu.trace_start"() <{level = 10 : i32, message = "bqd,bkd->bqk"}> : () -> ()
    %cst_52 = arith.constant dense<0.000000e+00> : vector<4x8x8xf32>
    %61 = tpu.matmul %56, %58, %cst_52 {dimension_numbers = #tpu.dot_dimension_numbers<[2], [2], [1], [1], [0, 0, 0, 1, 1, 1], [0], [0]>} : vector<4x8x8xbf16>, vector<4x8x8xbf16>, vector<4x8x8xf32> -> vector<4x8x8xf32>
    "tpu.trace_stop"() : () -> ()
    %cst_53 = arith.constant dense<0xFF800000> : vector<4x8xf32>
    %62 = vector.multi_reduction <maximumf>, %61, %cst_53 [2] : vector<4x8x8xf32> to vector<4x8xf32>
    %63 = vector.shape_cast %62 : vector<4x8xf32> to vector<4x8x1xf32>
    %64 = vector.broadcast %63 : vector<4x8x1xf32> to vector<4x8x8xf32>
    %65 = arith.subf %61, %64 : vector<4x8x8xf32>
    %66 = math.exp %65 : vector<4x8x8xf32>
    %cst_54 = arith.constant dense<0.000000e+00> : vector<4x8xf32>
    %67 = vector.multi_reduction <add>, %66, %cst_54 [2] : vector<4x8x8xf32> to vector<4x8xf32>
    %68 = vector.shape_cast %67 : vector<4x8xf32> to vector<4x8x1xf32>
    %cst_55 = arith.constant 1.000000e+00 : f32
    %69 = vector.broadcast %cst_55 : f32 to vector<4x8x1xf32>
    %70 = arith.divf %69, %68 : vector<4x8x1xf32>
    %71 = vector.broadcast %70 : vector<4x8x1xf32> to vector<4x8x8xf32>
    %72 = arith.mulf %66, %71 : vector<4x8x8xf32>
    %c0_56 = arith.constant 0 : index
    %c0_57 = arith.constant 0 : index
    %c0_58 = arith.constant 0 : index
    %73 = vector.load %arg7[%c0_56, %c0_57, %c0_58] : memref<4x8x8xf32, #tpu.memory_space<vmem>>, vector<4x8x8xf32>
    %74 = arith.addf %73, %72 : vector<4x8x8xf32>
    %c0_59 = arith.constant 0 : index
    %c0_60 = arith.constant 0 : index
    %c0_61 = arith.constant 0 : index
    %75 = vector.load %arg7[%c0_59, %c0_60, %c0_61] : memref<4x8x8xf32, #tpu.memory_space<vmem>>, vector<4x8x8xf32>
    tpu.vector_store %arg7[%c0_59, %c0_60, %c0_61], %74 {strides = array<i32>} : memref<4x8x8xf32, #tpu.memory_space<vmem>>, vector<4x8x8xf32>,
    %76 = arith.truncf %72 : vector<4x8x8xf32> to vector<4x8x8xbf16>
    "tpu.trace_start"() <{level = 10 : i32, message = "bqk,bkd->bqd"}> : () -> ()
    %cst_62 = arith.constant dense<0.000000e+00> : vector<4x8x8xf32>
    %77 = tpu.matmul %76, %60, %cst_62 {dimension_numbers = #tpu.dot_dimension_numbers<[2], [1], [1], [2], [0, 0, 0, 1, 1, 2], [0], [0]>} : vector<4x8x8xbf16>, vector<4x8x8xbf16>, vector<4x8x8xf32> -> vector<4x8x8xf32>
    "tpu.trace_stop"() : () -> ()
    %c0_63 = arith.constant 0 : index
    %c0_64 = arith.constant 0 : index
    %c16_65 = arith.constant 16 : index
    %78 = vector.load %arg9[%c0_63, %c0_64, %c16_65] : memref<4x8x32xf32, #tpu.memory_space<vmem>>, vector<4x8x8xf32>
    tpu.vector_store %arg9[%c0_63, %c0_64, %c16_65], %77 {strides = array<i32>} : memref<4x8x32xf32, #tpu.memory_space<vmem>>, vector<4x8x8xf32>,
    %c0_66 = arith.constant 0 : index
    %c0_67 = arith.constant 0 : index
    %c24 = arith.constant 24 : index
    %79 = vector.load %arg8[%c0_66, %c0_67, %c24] : memref<4x8x96xf32, #tpu.memory_space<vmem>>, vector<4x8x8xf32>
    %80 = arith.truncf %79 : vector<4x8x8xf32> to vector<4x8x8xbf16>
    %c0_68 = arith.constant 0 : index
    %c0_69 = arith.constant 0 : index
    %c56 = arith.constant 56 : index
    %81 = vector.load %arg8[%c0_68, %c0_69, %c56] : memref<4x8x96xf32, #tpu.memory_space<vmem>>, vector<4x8x8xf32>
    %82 = arith.truncf %81 : vector<4x8x8xf32> to vector<4x8x8xbf16>
    %c0_70 = arith.constant 0 : index
    %c0_71 = arith.constant 0 : index
    %c88 = arith.constant 88 : index
    %83 = vector.load %arg8[%c0_70, %c0_71, %c88] : memref<4x8x96xf32, #tpu.memory_space<vmem>>, vector<4x8x8xf32>
    %84 = arith.truncf %83 : vector<4x8x8xf32> to vector<4x8x8xbf16>
    "tpu.trace_start"() <{level = 10 : i32, message = "bqd,bkd->bqk"}> : () -> ()
    %cst_72 = arith.constant dense<0.000000e+00> : vector<4x8x8xf32>
    %85 = tpu.matmul %80, %82, %cst_72 {dimension_numbers = #tpu.dot_dimension_numbers<[2], [2], [1], [1], [0, 0, 0, 1, 1, 1], [0], [0]>} : vector<4x8x8xbf16>, vector<4x8x8xbf16>, vector<4x8x8xf32> -> vector<4x8x8xf32>
    "tpu.trace_stop"() : () -> ()
    %cst_73 = arith.constant dense<0xFF800000> : vector<4x8xf32>
    %86 = vector.multi_reduction <maximumf>, %85, %cst_73 [2] : vector<4x8x8xf32> to vector<4x8xf32>
    %87 = vector.shape_cast %86 : vector<4x8xf32> to vector<4x8x1xf32>
    %88 = vector.broadcast %87 : vector<4x8x1xf32> to vector<4x8x8xf32>
    %89 = arith.subf %85, %88 : vector<4x8x8xf32>
    %90 = math.exp %89 : vector<4x8x8xf32>
    %cst_74 = arith.constant dense<0.000000e+00> : vector<4x8xf32>
    %91 = vector.multi_reduction <add>, %90, %cst_74 [2] : vector<4x8x8xf32> to vector<4x8xf32>
    %92 = vector.shape_cast %91 : vector<4x8xf32> to vector<4x8x1xf32>
    %cst_75 = arith.constant 1.000000e+00 : f32
    %93 = vector.broadcast %cst_75 : f32 to vector<4x8x1xf32>
    %94 = arith.divf %93, %92 : vector<4x8x1xf32>
    %95 = vector.broadcast %94 : vector<4x8x1xf32> to vector<4x8x8xf32>
    %96 = arith.mulf %90, %95 : vector<4x8x8xf32>
    %c0_76 = arith.constant 0 : index
    %c0_77 = arith.constant 0 : index
    %c0_78 = arith.constant 0 : index
    %97 = vector.load %arg7[%c0_76, %c0_77, %c0_78] : memref<4x8x8xf32, #tpu.memory_space<vmem>>, vector<4x8x8xf32>
    %98 = arith.addf %97, %96 : vector<4x8x8xf32>
    %c0_79 = arith.constant 0 : index
    %c0_80 = arith.constant 0 : index
    %c0_81 = arith.constant 0 : index
    %99 = vector.load %arg7[%c0_79, %c0_80, %c0_81] : memref<4x8x8xf32, #tpu.memory_space<vmem>>, vector<4x8x8xf32>
    tpu.vector_store %arg7[%c0_79, %c0_80, %c0_81], %98 {strides = array<i32>} : memref<4x8x8xf32, #tpu.memory_space<vmem>>, vector<4x8x8xf32>,
    %100 = arith.truncf %96 : vector<4x8x8xf32> to vector<4x8x8xbf16>
    "tpu.trace_start"() <{level = 10 : i32, message = "bqk,bkd->bqd"}> : () -> ()
    %cst_82 = arith.constant dense<0.000000e+00> : vector<4x8x8xf32>
    %101 = tpu.matmul %100, %84, %cst_82 {dimension_numbers = #tpu.dot_dimension_numbers<[2], [1], [1], [2], [0, 0, 0, 1, 1, 2], [0], [0]>} : vector<4x8x8xbf16>, vector<4x8x8xbf16>, vector<4x8x8xf32> -> vector<4x8x8xf32>
    "tpu.trace_stop"() : () -> ()
    %c0_83 = arith.constant 0 : index
    %c0_84 = arith.constant 0 : index
    %c24_85 = arith.constant 24 : index
    %102 = vector.load %arg9[%c0_83, %c0_84, %c24_85] : memref<4x8x32xf32, #tpu.memory_space<vmem>>, vector<4x8x8xf32>
    tpu.vector_store %arg9[%c0_83, %c0_84, %c24_85], %101 {strides = array<i32>} : memref<4x8x32xf32, #tpu.memory_space<vmem>>, vector<4x8x8xf32>,
    %c0_86 = arith.constant 0 : index
    %c0_87 = arith.constant 0 : index
    %c0_88 = arith.constant 0 : index
    %103 = vector.load %arg7[%c0_86, %c0_87, %c0_88] : memref<4x8x8xf32, #tpu.memory_space<vmem>>, vector<4x8x8xf32>
    %cst_89 = arith.constant 2.500000e-01 : f32
    %104 = vector.broadcast %cst_89 : f32 to vector<4x8x8xf32>
    %105 = arith.mulf %103, %104 : vector<4x8x8xf32>
    %c0_90 = arith.constant 0 : index
    %c0_91 = arith.constant 0 : index
    %c0_92 = arith.constant 0 : index
    %106 = vector.load %arg7[%c0_90, %c0_91, %c0_92] : memref<4x8x8xf32, #tpu.memory_space<vmem>>, vector<4x8x8xf32>
    tpu.vector_store %arg7[%c0_90, %c0_91, %c0_92], %105 {strides = array<i32>} : memref<4x8x8xf32, #tpu.memory_space<vmem>>, vector<4x8x8xf32>,
    %c0_93 = arith.constant 0 : index
    %c0_94 = arith.constant 0 : index
    %c0_95 = arith.constant 0 : index
    %107 = vector.load %arg9[%c0_93, %c0_94, %c0_95] : memref<4x8x32xf32, #tpu.memory_space<vmem>>, vector<4x8x32xf32>
    %108 = vector.shape_cast %107 : vector<4x8x32xf32> to vector<32x32xf32>
    %109 = arith.truncf %108 : vector<32x32xf32> to vector<32x32xbf16>
    %c0_96 = arith.constant 0 : index
    %c0_97 = arith.constant 0 : index
    %110 = vector.load %arg4[%c0_96, %c0_97] : memref<32x32xbf16, #tpu.memory_space<vmem>>, vector<32x32xbf16>
    %cst_98 = arith.constant dense<0.000000e+00> : vector<32x32xf32>
    %111 = tpu.matmul %109, %110, %cst_98 {dimension_numbers = #tpu.dot_dimension_numbers<[1], [0], [0], [1], [0, 0, 1, 1], [], []>} : vector<32x32xbf16>, vector<32x32xbf16>, vector<32x32xf32> -> vector<32x32xf32>
    %c0_99 = arith.constant 0 : index
    %c0_100 = arith.constant 0 : index
    %112 = vector.load %arg5[%c0_99, %c0_100] : memref<1x32xf32, #tpu.memory_space<vmem>>, vector<1x32xf32>
    %113 = vector.broadcast %112 : vector<1x32xf32> to vector<32x32xf32>
    %114 = arith.addf %111, %113 : vector<32x32xf32>
    %c0_101 = arith.constant 0 : index
    %c0_102 = arith.constant 0 : index
    %115 = vector.load %arg6[%c0_101, %c0_102] : memref<32x32xf32, #tpu.memory_space<vmem>>, vector<32x32xf32>
    tpu.vector_store %arg6[%c0_101, %c0_102], %114 {strides = array<i32>} : memref<32x32xf32, #tpu.memory_space<vmem>>, vector<32x32xf32>,
    return
  }
  func.func @transform_0(%arg0: i32) -> (i32, i32) {
    %c0_i32 = arith.constant 0 : i32
    %c0_i32_0 = arith.constant 0 : i32
    return %arg0, %c0_i32 : i32, i32
  }
  func.func @transform_1(%arg0: i32) -> (i32, i32) {
    %c0_i32 = arith.constant 0 : i32
    %c0_i32_0 = arith.constant 0 : i32
    %c0_i32_1 = arith.constant 0 : i32
    return %c0_i32, %c0_i32_0 : i32, i32
  }
  func.func @transform_2(%arg0: i32) -> (i32, i32) {
    %c0_i32 = arith.constant 0 : i32
    %c0_i32_0 = arith.constant 0 : i32
    %c0_i32_1 = arith.constant 0 : i32
    return %c0_i32, %c0_i32_0 : i32, i32
  }
  func.func @transform_3(%arg0: i32) -> (i32, i32) {
    %c0_i32 = arith.constant 0 : i32
    %c0_i32_0 = arith.constant 0 : i32
    %c0_i32_1 = arith.constant 0 : i32
    return %c0_i32, %c0_i32_0 : i32, i32
  }
  func.func @transform_4(%arg0: i32) -> (i32, i32) {
    %c0_i32 = arith.constant 0 : i32
    %c0_i32_0 = arith.constant 0 : i32
    %c0_i32_1 = arith.constant 0 : i32
    return %c0_i32, %c0_i32_0 : i32, i32
  }
  func.func @transform_5(%arg0: i32) -> (i32, i32) {
    %c0_i32 = arith.constant 0 : i32
    %c0_i32_0 = arith.constant 0 : i32
    return %arg0, %c0_i32 : i32, i32
  }
  func.func @transform_6(%arg0: i32) -> (i32, i32, i32) {
    %c0_i32 = arith.constant 0 : i32
    %c0_i32_0 = arith.constant 0 : i32
    %c0_i32_1 = arith.constant 0 : i32
    return %arg0, %c0_i32, %c0_i32_0 : i32, i32, i32
  }
}

</mosaic_0001>

<bundles_post_ra>
// kernel: tpu_custom_call.1
= control target key start
LH: loop header
LB: loop body
LE: loop exit
PB: predicated region body
PF: predicated region fallthrough
CT: control target
= control target key end

     0   :  { %12 = vsyncpa [#allocation5], 0  ;;  %s3213_s0 = inlined_call_operand.hbm [shape: f32[32,32], index: 0, kind: input, shape index: {}]   ;;  %s3214_s1 = inlined_call_operand.hbm [shape: bf16[32,96], index: 1, kind: input, shape index: {}]   ;;  %s3215_s2 = inlined_call_operand.vmem [shape: f32[1,96], index: 2, kind: input, shape index: {}]   ;;  %s3216_s3 = inlined_call_operand.hbm [shape: bf16[32,32], index: 3, kind: input, shape index: {}]   ;;  %s3217_s4 = inlined_call_operand.vmem [shape: f32[1,32], index: 4, kind: input, shape index: {}]   ;;  %s3218_s5 = inlined_call_operand.hbm [shape: f32[32,32], index: 5, kind: output, shape index: {0}]   ;;  %s3219_s6 = inlined_call_operand.hbm [shape: f32[4,8,8], index: 6, kind: output, shape index: {1}]  }
   0x1   :  { %13 = vsyncpa [#allocation8], 0 }
   0x2   :  { %14 = vsyncpa [#allocation6], 0 }
   0x3   :  { %15 = vsyncpa [#allocation12], 0  ;;  %s2746_s21 = smov [#allocation7]   ;;  %s2628_s25 = scalar_lea.hbm %s3214_s1, 256 }
   0x4   :  { %s33_s22 = sshll.u32 %s2746_s21, 4  ;;  %p2629_p0 = scmp.ne.s32.totalorder %s3214_s1, %s2628_s25  ;;  %s34_s22 = int_to_ptr.vmem [resolvable:$true] %s33_s22 }
   0x5   :  { %p2632_p1 = scmp.lt.u32.totalorder %s2628_s25, %s3214_s1 }
   0x7   :  { %p2634_p2 = pnand %p2632_p1, %p2629_p0 }
   0x9   :  { %2637 = shalt.err (!%p2634_p2)
}
   0xa   :  { %s2638_s30 = scalar_lea.vmem %s34_s22, 256  ;;  %p2643_p4 = scmp.lt.s32.totalorder %s34_s22, %s34_s22 }
   0xb   :  { %p2639_p3 = scmp.ne.s32.totalorder %s34_s22, %s2638_s30  ;;  %p2644_p5 = scmp.lt.s32.totalorder %s2638_s30, %s2638_s30 }
   0xd   :  { %p2645_p6 = por %p2644_p5, %p2643_p4 }
   0xf   :  { %p2646_p7 = pnand %p2645_p6, %p2639_p3 }
  0x11   :  { %2649 = shalt.err (!%p2646_p7)
}
  0x12   :  { %s2747_s7 = smov 64   ;;  %s2748_s8 = smov 4  }
  0x13   :  { %39 = dma.hbm_to_vmem [thread:$0]  %s3214_s1, 256, %s34_s22, [#allocation8], %s2747_s7, %s2747_s7, %s2748_s8  }
  0x14   :  { %s2749_s11 = smov [#allocation4]   ;;  %s2650_s15 = scalar_lea.hbm %s3213_s0, 512 }
  0x15   :  { %s21_s12 = sshll.u32 %s2749_s11, 4  ;;  %p2651_p8 = scmp.ne.s32.totalorder %s3213_s0, %s2650_s15  ;;  %s22_s12 = int_to_ptr.vmem [resolvable:$true] %s21_s12 }
  0x16   :  { %p2654_p9 = scmp.lt.u32.totalorder %s2650_s15, %s3213_s0 }
  0x18   :  { %p2656_p10 = pnand %p2654_p9, %p2651_p8 }
  0x1a   :  { %2659 = shalt.err (!%p2656_p10)
}
  0x1b   :  { %s2660_s20 = scalar_lea.vmem %s22_s12, 512  ;;  %p2665_p12 = scmp.lt.s32.totalorder %s22_s12, %s22_s12 }
  0x1c   :  { %p2661_p11 = scmp.ne.s32.totalorder %s22_s12, %s2660_s20  ;;  %p2666_p13 = scmp.lt.s32.totalorder %s2660_s20, %s2660_s20 }
  0x1e   :  { %p2667_p0 = por %p2666_p13, %p2665_p12 }
  0x20   :  { %p2668_p1 = pnand %p2667_p0, %p2661_p11 }
  0x22   :  { %2671 = shalt.err (!%p2668_p1)
}
  0x23   :  { %s2750_s1 = smov 128   ;;  %s2751_s21 = smov 8  }
  0x24   :  { %27 = dma.hbm_to_vmem [thread:$0]  %s3213_s0, 512, %s22_s12, [#allocation5], %s2750_s1, %s2750_s1, %s2751_s21  }
  0x25   :  { %s2752_s24 = smov [#allocation9]   ;;  %s2672_s28 = scalar_lea.hbm %s3216_s3, 256 }
  0x26   :  { %s47_s25 = sshll.u32 %s2752_s24, 4  ;;  %p2673_p2 = scmp.ne.s32.totalorder %s3216_s3, %s2672_s28  ;;  %s48_s25 = int_to_ptr.vmem [resolvable:$true] %s47_s25 }
  0x27   :  { %p2676_p3 = scmp.lt.u32.totalorder %s2672_s28, %s3216_s3 }
  0x29   :  { %p2678_p4 = pnand %p2676_p3, %p2673_p2 }
  0x2b   :  { %2681 = shalt.err (!%p2678_p4)
}
  0x2c   :  { %s2682_s11 = scalar_lea.vmem %s48_s25, 256  ;;  %p2687_p6 = scmp.lt.s32.totalorder %s48_s25, %s48_s25 }
  0x2d   :  { %p2683_p5 = scmp.ne.s32.totalorder %s48_s25, %s2682_s11  ;;  %p2688_p7 = scmp.lt.s32.totalorder %s2682_s11, %s2682_s11 }
  0x2f   :  { %p2689_p8 = por %p2688_p7, %p2687_p6 }
  0x31   :  { %p2690_p9 = pnand %p2689_p8, %p2683_p5 }
  0x33   :  { %2693 = shalt.err (!%p2690_p9)
}
  0x34   :  { %53 = dma.hbm_to_vmem [thread:$0]  %s3216_s3, 256, %s48_s25, [#allocation8], %s2747_s7, %s2747_s7, %s2748_s8  }
  0x35   :  { %2738 = dma.done.wait [#allocation5], 512  }
  0x36   :  { %2739 = vsyncadd [#allocation5], 4294966784 }
  0x37   :  { %2740 = dma.done.wait [#allocation8], 512  }
  0x38   :  { %2741 = vsyncadd [#allocation8], 4294966784  ;;  %v2560_v0 = vld [vmem:[#allocation7] sm:$0xff]   ;;  %v2561_v1 = vld [vmem:[#allocation7 + $0x8] sm:$0xff]   ;;  %vm95_vm0 = vcmask 261120   ;;  %vm151_vm1 = vcmask 785408  }
  0x39   :  { %2329 = vmatprep.subr.bf16.mxu0 %v2560_v0  ;;  %v66_v2 = vld [vmem:[#allocation4] sm:$0xff]  ;;  %v67_v3 = vld [vmem:[#allocation4 + $0x8] sm:$0xff]  ;;  %v68_v4 = vld [vmem:[#allocation4 + $0x10] sm:$0xff]  ;;  %v2753_v12 = vmov 0.0   ;;  %vm2754_vm2 = vmmov 0   ;;  %vm167_vm3 = vcmask 64512  }
  0x3a   :  { %2330 = vmatpush3.bf16.msra.mxu0 %v2560_v0  ;;  %v70_v5 = vpack.c.bf16 %v67_v3, %v66_v2  ;;  %v69_v6 = vld [vmem:[#allocation4 + $0x18] sm:$0xff]  ;;  %v2215_v8 = vld [vmem:[%s3215_s2] ss:$0 sm:$0xff]  ;;  %2337 = vmatprep.subr.bf16.mxu1 %v2753_v12  ;;  %s2755_s2 = smov 96   ;;  %vm422_vm4 = vcmask 1043456   ;;  %s2756_s13 = smov 88  }
  0x3b   :  { %2331 = vmatprep.subr.bf16.mxu0 %v2561_v1  ;;  %v71_v7 = vpack.c.bf16 %v69_v6, %v68_v4  ;;  %2339 = vmatprep.mubr.msk.bf16.mxu1 %vm2754_vm2, %v2753_v12  ;;  %s2757_s14 = smov 120   ;;  %s2759_s15 = smov 80   ;;  %vm1098_vm5 = vcmask 130112   ;;  %vm1587_vm6 = vcmask 195712   ;;  %vm2076_vm7 = vcmask 261312  }
  0x3c   :  { %2333 = vmatprep.mubr.msk.bf16.mxu0 %vm95_vm0, %v70_v5  ;;  %s2760_s16 = smov 112   ;;  %s2761_s17 = smov 48  }
  0x3d   :  { %s2762_s18 = smov 72   ;;  %s2763_s19 = smov 104  }
  0x3e   :  { %2332 = vmatpush3.bf16.msra.mxu0 %v2561_v1  ;;  %s2764_s20 = smov 40   ;;  %s2765_s22 = smov 16  }
  0x3f   :  { %2343 = vmatprep.subr.bf16.mxu0 %v2753_v12  ;;  %s2766_s23 = smov 24   ;;  %s2767_s24 = smov [#allocation11]  }
  0x40   :  { %s2198_s25 = sshll.u32 %s2767_s24, 4  ;;  %s2199_s25 = int_to_ptr.vmem [resolvable:$true] %s2198_s25 }
  0x41   :  { %2334 = vmatmul.mubr.msk.bf16.vlgmr.msra.gmra.mrb[0].mxu0 %vm95_vm0, %v71_v7  ;;  %s2694_s26 = scalar_lea.vmem %s2199_s25, 512  ;;  %p2699_p11 = scmp.lt.s32.totalorder %s2199_s25, %s2199_s25 }
  0x42   :  { %2345 = vmatprep.mubr.msk.bf16.mxu0 %vm2754_vm2, %v2753_v12  ;;  %p2695_p10 = scmp.ne.s32.totalorder %s2199_s25, %s2694_s26  ;;  %p2700_p12 = scmp.lt.s32.totalorder %s2694_s26, %s2694_s26 }
  0x44   :  { %p2701_p13 = por %p2700_p12, %p2699_p11 }
  0x46   :  { %p2702_p0 = pnand %p2701_p13, %p2695_p10 }
 0x114   :  { %v2335_v9 = vpop.f32.mrb[0].mxu0 }
 0x115   :  { %v145_v10 = vadd.f32 %v2335_v9, %v2215_v8  ;;  %v136_v11 = vpop.f32.mrb[1].mxu0 }
 0x116   :  { %v137_v13 = vadd.f32 %v2215_v8, %v136_v11  ;;  %v2336_v14 = vpop.f32.mrb[2].mxu0 }
 0x117   :  { %154 = vst.msk [vmem:[#allocation2 + $0x10] sm:$0xff] %vm151_vm1, %v145_v10  ;;  %v148_v15 = vadd.f32 %v2336_v14, %v2215_v8  ;;  %v139_v16 = vpop.f32.mrb[3].mxu0 }
 0x118   :  { %152 = vst.msk [vmem:[#allocation2] sm:$0xff] %vm151_vm1, %v137_v13  ;;  %v140_v17 = vadd.f32 %v2215_v8, %v139_v16 }
 0x119   :  { %155 = vst.msk [vmem:[#allocation2 + $0x18] sm:$0xff] %vm151_vm1, %v148_v15 }
 0x11a   :  { %153 = vst.msk [vmem:[#allocation2 + $0x8] sm:$0xff] %vm151_vm1, %v140_v17 }
 0x11e   :  { %v158_v18 = vld [vmem:[#allocation2 + $0x10] sm:$0xff] }
 0x11f   :  { %v2860_v19 = vpack.c.bf16 %v158_v18, %v158_v18  ;;  %v156_v20 = vld [vmem:[#allocation2] sm:$0xff] }
 0x120   :  { %v2862_v21 = vpack.c.bf16 %v156_v20, %v156_v20  ;;  %v159_v22 = vld [vmem:[#allocation2 + $0x18] sm:$0xff] }
 0x121   :  { %264 = vrot.lane.b32.xlu1 %v2860_v19, %s2755_s2  ;;  %v157_v23 = vld [vmem:[#allocation2 + $0x8] sm:$0xff]  ;;  %v2866_v24 = vpack.c.bf16 %v159_v22, %v159_v22 }
 0x122   :  { %165 = vrot.lane.b32.xlu0 %v2862_v21, %s2755_s2  ;;  %v2868_v25 = vpack.c.bf16 %v157_v23, %v157_v23 }
 0x125   :  { %313 = vrot.lane.b32.xlu1 %v2866_v24, %s2755_s2 }
 0x126   :  { %215 = vrot.lane.b32.xlu0 %v2868_v25, %s2755_s2 }
 0x193   :  { %v265_v28 = vpop.permute.xlu1 %264 }
 0x194   :  { %v166_v26 = vpop.permute.xlu0 %165  ;;  %v270_v31 = vsel %vm167_vm3, %v265_v28, 0 }
 0x195   :  { %v172_v27 = vsel %vm167_vm3, %v166_v26, 0 }
 0x196   :  { %2338 = vmatpush3.bf16.xpose.msra.mxu1 %v172_v27 }
 0x197   :  { %2349 = vmatprep.subr.bf16.mxu1 %v2753_v12  ;;  %v314_v32 = vpop.permute.xlu1 %313 }
 0x198   :  { %v216_v29 = vpop.permute.xlu0 %215  ;;  %v319_v33 = vsel %vm167_vm3, %v314_v32, 0 }
 0x199   :  { %v221_v30 = vsel %vm167_vm3, %v216_v29, 0 }
 0x19a   :  { %2344 = vmatpush3.bf16.xpose.msra.mxu0 %v221_v30 }
 0x19b   :  { %2355 = vmatprep.subr.bf16.mxu0 %v2753_v12 }
 0x19d   :  { %2340 = vmatmul.mubr.msk.bf16.vlgmr.msra.gmra.mrb[0].mxu1 %vm167_vm3, %v2862_v21 }
 0x19e   :  { %2350 = vmatpush3.bf16.xpose.msra.mxu1 %v270_v31  ;;  %2351 = vmatprep.mubr.msk.bf16.mxu1 %vm2754_vm2, %v2753_v12 }
 0x19f   :  { %2361 = vmatprep.subr.bf16.mxu1 %v2753_v12 }
 0x1a1   :  { %2346 = vmatmul.mubr.msk.bf16.vlgmr.msra.gmra.mrb[4].mxu0 %vm167_vm3, %v2868_v25 }
 0x1a2   :  { %2356 = vmatpush3.bf16.xpose.msra.mxu0 %v319_v33  ;;  %2357 = vmatprep.mubr.msk.bf16.mxu0 %vm2754_vm2, %v2753_v12 }
 0x1a3   :  { %2367 = vmatprep.subr.bf16.mxu0 %v2753_v12 }
 0x1a5   :  { %2352 = vmatmul.mubr.msk.bf16.vlgmr.msra.gmra.mrb[4].mxu1 %vm167_vm3, %v2860_v19 }
 0x1a6   :  { %2363 = vmatprep.mubr.msk.bf16.mxu1 %vm2754_vm2, %v2753_v12 }
 0x1a9   :  { %2358 = vmatmul.mubr.msk.bf16.vlgmr.msra.gmra.mrb[8].mxu0 %vm167_vm3, %v2866_v24 }
 0x1aa   :  { %2369 = vmatprep.mubr.msk.bf16.mxu0 %vm2754_vm2, %v2753_v12 }
 0x270   :  { %v208_v34 = vpop.f32.mrb[0].mxu1 }
 0x271   :  { %v2341_v35 = vpop.f32.mrb[1].mxu1  ;;  %v361_v36 = vsel %vm167_vm3, %v208_v34, -inf }
 0x272   :  { %362 = vmax.xlane.f32.xlu0 %v361_v36  ;;  %v211_v37 = vpop.f32.mrb[2].mxu1 }
 0x273   :  { %v2342_v38 = vpop.f32.mrb[3].mxu1 }
 0x274   :  { %v257_v39 = vpop.f32.mrb[4].mxu0 }
 0x275   :  { %v2347_v40 = vpop.f32.mrb[5].mxu0  ;;  %v364_v41 = vsel %vm167_vm3, %v257_v39, -inf }
 0x276   :  { %365 = vmax.xlane.f32.xlu1 %v364_v41  ;;  %v260_v42 = vpop.f32.mrb[6].mxu0 }
 0x277   :  { %v2348_v43 = vpop.f32.mrb[7].mxu0 }
 0x278   :  { %v306_v44 = vpop.f32.mrb[4].mxu1 }
 0x279   :  { %v2353_v45 = vpop.f32.mrb[5].mxu1  ;;  %v367_v46 = vsel %vm167_vm3, %v306_v44, -inf }
 0x27a   :  { %368 = vmax.xlane.f32.xlu0 %v367_v46  ;;  %v309_v47 = vpop.f32.mrb[6].mxu1 }
 0x27b   :  { %v2354_v48 = vpop.f32.mrb[7].mxu1 }
 0x27c   :  { %v355_v49 = vpop.f32.mrb[8].mxu0 }
 0x27d   :  { %v2359_v50 = vpop.f32.mrb[9].mxu0  ;;  %v370_v51 = vsel %vm167_vm3, %v355_v49, -inf }
 0x27e   :  { %371 = vmax.xlane.f32.xlu0 %v370_v51  ;;  %v358_v52 = vpop.f32.mrb[10].mxu0 }
 0x27f   :  { %v2360_v53 = vpop.f32.mrb[11].mxu0 }
 0x287   :  { %417 = vrot.lane.b32.xlu1 %v2862_v21, %s2747_s7 }
 0x2ff   :  { %v363_v54 = vpop.xlane.xlu0 %362 }
 0x300   :  { %v373_v55 = vsub.f32 %v208_v34, %v363_v54 }
 0x302   :  { %v377_v56 = vmul.f32 1.442695, %v373_v55 }
 0x303   :  { %v366_v57 = vpop.xlane.xlu1 %365 }
 0x304   :  { %2564 = vpow2.f32 %v377_v56  ;;  %v374_v58 = vsub.f32 %v257_v39, %v366_v57 }
 0x306   :  { %v379_v59 = vmul.f32 1.442695, %v374_v58 }
 0x307   :  { %v418_v60 = vpop.permute.xlu1 %417  ;;  %v369_v2 = vpop.xlane.xlu0 %368 }
 0x308   :  { %2566 = vpow2.f32 %v379_v59  ;;  %v424_v61 = vsel %vm422_vm4, %v418_v60, 0  ;;  %v375_v4 = vsub.f32 %v306_v44, %v369_v2 }
 0x309   :  { %2362 = vmatpush3.bf16.msra.mxu1 %v424_v61 }
 0x30a   :  { %2373 = vmatprep.subr.bf16.mxu1 %v2753_v12  ;;  %v381_v6 = vmul.f32 1.442695, %v375_v4 }
 0x30b   :  { %v372_v3 = vpop.xlane.xlu0 %371 }
 0x30c   :  { %v376_v5 = vsub.f32 %v355_v49, %v372_v3  ;;  %2568 = vpow2.f32 %v381_v6 }
 0x30e   :  { %v2565_v62 = vpop.eup %2564  ;;  %v383_v7 = vmul.f32 1.442695, %v376_v5 }
 0x30f   :  { %v385_v63 = vsel %vm167_vm3, %v2565_v62, 0.0 }
 0x310   :  { %386 = vadd.xlane.f32.xlu1 %v385_v63  ;;  %2570 = vpow2.f32 %v383_v7 }
 0x312   :  { %v2567_v0 = vpop.eup %2566 }
 0x313   :  { %v388_v1 = vsel %vm167_vm3, %v2567_v0, 0.0 }
 0x314   :  { %389 = vadd.xlane.f32.xlu0 %v388_v1 }
 0x316   :  { %v2569_v8 = vpop.eup %2568 }
 0x317   :  { %v391_v10 = vsel %vm167_vm3, %v2569_v8, 0.0 }
 0x31a   :  { %v2571_v9 = vpop.eup %2570 }
 0x31b   :  { %v394_v11 = vsel %vm167_vm3, %v2571_v9, 0.0 }
 0x321   :  { %514 = vrot.lane.b32.xlu1 %v2860_v19, %s2747_s7 }
 0x325   :  { %562 = vrot.lane.b32.xlu1 %v2866_v24, %s2747_s7 }
 0x32a   :  { %466 = vrot.lane.b32.xlu0 %v2868_v25, %s2747_s7  ;;  %s2758_s7 = smov 56  }
 0x349   :  { %392 = vadd.xlane.f32.xlu1 %v391_v10  ;;  %395 = vadd.xlane.f32.xlu0 %v394_v11 }
 0x35a   :  { %676 = vrot.lane.b32.xlu1 %v2868_v25, %s2756_s13 }
 0x35e   :  { %674 = vrot.lane.b32.xlu1 %v2868_v25, %s2757_s14 }
 0x35f   :  { %625 = vrot.lane.b32.xlu0 %v2862_v21, %s2756_s13 }
 0x362   :  { %778 = vrot.lane.b32.xlu1 %v2866_v24, %s2756_s13 }
 0x363   :  { %623 = vrot.lane.b32.xlu0 %v2862_v21, %s2757_s14 }
 0x366   :  { %776 = vrot.lane.b32.xlu1 %v2866_v24, %s2757_s14 }
 0x367   :  { %727 = vrot.lane.b32.xlu0 %v2860_v19, %s2756_s13 }
 0x36b   :  { %725 = vrot.lane.b32.xlu0 %v2860_v19, %s2757_s14 }
 0x39d   :  { %v387_v13 = vpop.xlane.xlu1 %386 }
 0x39e   :  { %2572 = vrcp.f32 %v387_v13 }
 0x3a1   :  { %v390_v14 = vpop.xlane.xlu0 %389  ;;  %v515_v18 = vpop.permute.xlu1 %514 }
 0x3a2   :  { %2574 = vrcp.f32 %v390_v14  ;;  %v520_v26 = vsel %vm422_vm4, %v515_v18, 0 }
 0x3a5   :  { %v467_v15 = vpop.permute.xlu0 %466  ;;  %v563_v28 = vpop.permute.xlu1 %562 }
 0x3a6   :  { %v472_v16 = vsel %vm422_vm4, %v467_v15, 0  ;;  %v568_v30 = vsel %vm422_vm4, %v563_v28, 0 }
 0x3a7   :  { %2368 = vmatpush3.bf16.msra.mxu0 %v472_v16 }
 0x3a8   :  { %v2573_v17 = vpop.eup %2572  ;;  %2379 = vmatprep.subr.bf16.mxu0 %v2753_v12 }
 0x3a9   :  { %v405_v20 = vmul.f32 %v2573_v17, %v2565_v62 }
 0x3ab   :  { %409 = vst.msk [vmem:[#allocation11] sm:$0xff] %vm167_vm3, %v405_v20  ;;  %v413_v22 = vpack.c.bf16 %v405_v20, %v405_v20 }
 0x3ac   :  { %v2575_v23 = vpop.eup %2574 }
 0x3ad   :  { %v406_v27 = vmul.f32 %v2575_v23, %v2567_v0  ;;  %2364 = vmatmul.mubr.msk.bf16.vlgmr.msra.gmra.mrb[8].mxu1 %vm167_vm3, %v413_v22 }
 0x3ae   :  { %2374 = vmatpush3.bf16.msra.mxu1 %v520_v26  ;;  %2375 = vmatprep.mubr.msk.bf16.mxu1 %vm2754_vm2, %v2753_v12 }
 0x3af   :  { %410 = vst.msk [vmem:[#allocation11 + $0x8] sm:$0xff] %vm167_vm3, %v406_v27  ;;  %v414_v29 = vpack.c.bf16 %v406_v27, %v406_v27  ;;  %2385 = vmatprep.subr.bf16.mxu1 %v2753_v12 }
 0x3b1   :  { %2370 = vmatmul.mubr.msk.bf16.vlgmr.msra.gmra.mrb[12].mxu0 %vm167_vm3, %v414_v29 }
 0x3b2   :  { %2380 = vmatpush3.bf16.msra.mxu0 %v568_v30  ;;  %2381 = vmatprep.mubr.msk.bf16.mxu0 %vm2754_vm2, %v2753_v12 }
 0x3b3   :  { %2391 = vmatprep.subr.bf16.mxu0 %v2753_v12 }
 0x3d6   :  { %v393_v31 = vpop.xlane.xlu1 %392  ;;  %v396_v32 = vpop.xlane.xlu0 %395 }
 0x3d7   :  { %2576 = vrcp.f32 %v393_v31 }
 0x3d8   :  { %2578 = vrcp.f32 %v396_v32 }
 0x3da   :  { %v626_v33 = vpop.permute.xlu0 %625  ;;  %v677_v34 = vpop.permute.xlu1 %676 }
 0x3db   :  { %v631_v42 = vsel %vm167_vm3, %v626_v33, 0  ;;  %v682_v44 = vsel %vm167_vm3, %v677_v34, 0 }
 0x3de   :  { %v624_v40 = vpop.permute.xlu0 %623  ;;  %v675_v43 = vpop.permute.xlu1 %674 }
 0x3e1   :  { %v2577_v35 = vpop.eup %2576 }
 0x3e2   :  { %v2579_v36 = vpop.eup %2578  ;;  %v407_v37 = vmul.f32 %v2577_v35, %v2569_v8  ;;  %v728_v45 = vpop.permute.xlu0 %727 }
 0x3e3   :  { %v408_v38 = vmul.f32 %v2579_v36, %v2571_v9  ;;  %v779_v46 = vpop.permute.xlu1 %778  ;;  %v733_v47 = vsel %vm167_vm3, %v728_v45, 0 }
 0x3e4   :  { %411 = vst.msk [vmem:[#allocation11 + $0x10] sm:$0xff] %vm167_vm3, %v407_v37  ;;  %v415_v39 = vpack.c.bf16 %v407_v37, %v407_v37  ;;  %v784_v48 = vsel %vm167_vm3, %v779_v46, 0 }
 0x3e5   :  { %412 = vst.msk [vmem:[#allocation11 + $0x18] sm:$0xff] %vm167_vm3, %v408_v38  ;;  %v416_v41 = vpack.c.bf16 %v408_v38, %v408_v38 }
 0x3e6   :  { %2376 = vmatmul.mubr.msk.bf16.vlgmr.msra.gmra.mrb[12].mxu1 %vm167_vm3, %v415_v39  ;;  %v726_v49 = vpop.permute.xlu0 %725 }
 0x3e7   :  { %2382 = vmatmul.mubr.msk.bf16.vlgmr.msra.gmra.mrb[16].mxu0 %vm167_vm3, %v416_v41  ;;  %2386 = vmatpush3.bf16.xpose.msra.mxu1 %v631_v42  ;;  %v777_v50 = vpop.permute.xlu1 %776 }
 0x3e8   :  { %2392 = vmatpush3.bf16.xpose.msra.mxu0 %v682_v44  ;;  %2387 = vmatprep.mubr.msk.bf16.mxu1 %vm2754_vm2, %v2753_v12 }
 0x3e9   :  { %2393 = vmatprep.mubr.msk.bf16.mxu0 %vm2754_vm2, %v2753_v12  ;;  %2397 = vmatprep.subr.bf16.mxu1 %v2753_v12 }
 0x3ea   :  { %2403 = vmatprep.subr.bf16.mxu0 %v2753_v12 }
 0x3ee   :  { %2388 = vmatmul.mubr.msk.bf16.vlgmr.msra.gmra.mrb[16].mxu1 %vm167_vm3, %v624_v40 }
 0x3ef   :  { %2394 = vmatmul.mubr.msk.bf16.vlgmr.msra.gmra.mrb[20].mxu0 %vm167_vm3, %v675_v43  ;;  %2398 = vmatpush3.bf16.xpose.msra.mxu1 %v733_v47 }
 0x3f0   :  { %2404 = vmatpush3.bf16.xpose.msra.mxu0 %v784_v48  ;;  %2399 = vmatprep.mubr.msk.bf16.mxu1 %vm2754_vm2, %v2753_v12 }
 0x3f1   :  { %2405 = vmatprep.mubr.msk.bf16.mxu0 %vm2754_vm2, %v2753_v12  ;;  %2409 = vmatprep.subr.bf16.mxu1 %v2753_v12 }
 0x3f2   :  { %2415 = vmatprep.subr.bf16.mxu0 %v2753_v12 }
 0x3f6   :  { %2400 = vmatmul.mubr.msk.bf16.vlgmr.msra.gmra.mrb[20].mxu1 %vm167_vm3, %v726_v49 }
 0x3f7   :  { %2406 = vmatmul.mubr.msk.bf16.vlgmr.msra.gmra.mrb[24].mxu0 %vm167_vm3, %v777_v50  ;;  %2411 = vmatprep.mubr.msk.bf16.mxu1 %vm2754_vm2, %v2753_v12 }
 0x3f8   :  { %2417 = vmatprep.mubr.msk.bf16.mxu0 %vm2754_vm2, %v2753_v12 }
 0x480   :  { %v460_v51 = vpop.f32.mrb[8].mxu1 }
 0x481   :  { %610 = vst.msk [vmem:[#allocation3] sm:$0xff] %vm167_vm3, %v460_v51  ;;  %v2365_v52 = vpop.f32.mrb[9].mxu1 }
 0x482   :  { %v463_v53 = vpop.f32.mrb[10].mxu1 }
 0x483   :  { %v2366_v54 = vpop.f32.mrb[11].mxu1 }
 0x484   :  { %v508_v55 = vpop.f32.mrb[12].mxu0 }
 0x485   :  { %611 = vst.msk [vmem:[#allocation3 + $0x8] sm:$0xff] %vm167_vm3, %v508_v55  ;;  %v2371_v56 = vpop.f32.mrb[13].mxu0 }
 0x486   :  { %v511_v57 = vpop.f32.mrb[14].mxu0 }
 0x487   :  { %v2372_v58 = vpop.f32.mrb[15].mxu0 }
 0x488   :  { %v874_v58 = vld [vmem:[#allocation11] sm:$0xff] }
 0x4b9   :  { %v556_v59 = vpop.f32.mrb[12].mxu1 }
 0x4ba   :  { %612 = vst.msk [vmem:[#allocation3 + $0x10] sm:$0xff] %vm167_vm3, %v556_v59  ;;  %v604_v60 = vpop.f32.mrb[16].mxu0  ;;  %v2377_v61 = vpop.f32.mrb[13].mxu1 }
 0x4bb   :  { %613 = vst.msk [vmem:[#allocation3 + $0x18] sm:$0xff] %vm167_vm3, %v604_v60  ;;  %v2383_v62 = vpop.f32.mrb[17].mxu0  ;;  %v559_v63 = vpop.f32.mrb[14].mxu1  ;;  %v875_v61 = vld [vmem:[#allocation11 + $0x8] sm:$0xff] }
 0x4bc   :  { %v607_v0 = vpop.f32.mrb[18].mxu0  ;;  %v2378_v1 = vpop.f32.mrb[15].mxu1 }
 0x4bd   :  { %v2384_v2 = vpop.f32.mrb[19].mxu0 }
 0x4c1   :  { %v667_v3 = vpop.f32.mrb[16].mxu1 }
 0x4c2   :  { %v718_v4 = vpop.f32.mrb[20].mxu0  ;;  %v2389_v5 = vpop.f32.mrb[17].mxu1  ;;  %v826_v6 = vsel %vm167_vm3, %v667_v3, -inf }
 0x4c3   :  { %v2395_v7 = vpop.f32.mrb[21].mxu0  ;;  %v829_v8 = vsel %vm167_vm3, %v718_v4, -inf  ;;  %827 = vmax.xlane.f32.xlu0 %v826_v6  ;;  %v670_v9 = vpop.f32.mrb[18].mxu1 }
 0x4c4   :  { %830 = vmax.xlane.f32.xlu1 %v829_v8  ;;  %v721_v10 = vpop.f32.mrb[22].mxu0  ;;  %v2390_v11 = vpop.f32.mrb[19].mxu1 }
 0x4c5   :  { %v2396_v13 = vpop.f32.mrb[23].mxu0  ;;  %v877_v10 = vld [vmem:[#allocation11 + $0x18] sm:$0xff] }
 0x4c9   :  { %v769_v14 = vpop.f32.mrb[20].mxu1 }
 0x4ca   :  { %v820_v15 = vpop.f32.mrb[24].mxu0  ;;  %v2401_v16 = vpop.f32.mrb[21].mxu1  ;;  %v832_v17 = vsel %vm167_vm3, %v769_v14, -inf }
 0x4cb   :  { %v2407_v18 = vpop.f32.mrb[25].mxu0  ;;  %833 = vmax.xlane.f32.xlu0 %v832_v17  ;;  %v772_v20 = vpop.f32.mrb[22].mxu1  ;;  %v835_v27 = vsel %vm167_vm3, %v820_v15, -inf  ;;  %v876_v17 = vld [vmem:[#allocation11 + $0x10] sm:$0xff] }
 0x4cc   :  { %v823_v22 = vpop.f32.mrb[26].mxu0  ;;  %v2402_v23 = vpop.f32.mrb[23].mxu1 }
 0x4cd   :  { %v2408_v26 = vpop.f32.mrb[27].mxu0 }
 0x4cf   :  { %836 = vmax.xlane.f32.xlu0 %v835_v27 }
 0x4d5   :  { %890 = vrot.lane.b32.xlu1 %v2862_v21, %s2758_s7 }
 0x550   :  { %v828_v28 = vpop.xlane.xlu0 %827 }
 0x551   :  { %v831_v29 = vpop.xlane.xlu1 %830  ;;  %v838_v30 = vsub.f32 %v667_v3, %v828_v28 }
 0x552   :  { %v839_v31 = vsub.f32 %v718_v4, %v831_v29 }
 0x553   :  { %v842_v32 = vmul.f32 1.442695, %v838_v30 }
 0x554   :  { %v844_v33 = vmul.f32 1.442695, %v839_v31 }
 0x555   :  { %2580 = vpow2.f32 %v842_v32  ;;  %v891_v34 = vpop.permute.xlu1 %890 }
 0x556   :  { %2582 = vpow2.f32 %v844_v33  ;;  %v896_v35 = vsel %vm422_vm4, %v891_v34, 0 }
 0x557   :  { %2410 = vmatpush3.bf16.msra.mxu1 %v896_v35 }
 0x558   :  { %2421 = vmatprep.subr.bf16.mxu1 %v2753_v12  ;;  %v834_v40 = vpop.xlane.xlu0 %833 }
 0x559   :  { %v840_v43 = vsub.f32 %v769_v14, %v834_v40 }
 0x55b   :  { %v846_v45 = vmul.f32 1.442695, %v840_v43 }
 0x55c   :  { %v837_v41 = vpop.xlane.xlu0 %836 }
 0x55d   :  { %v841_v42 = vsub.f32 %v820_v15, %v837_v41 }
 0x55f   :  { %v2581_v36 = vpop.eup %2580  ;;  %v848_v44 = vmul.f32 1.442695, %v841_v42 }
 0x560   :  { %v2583_v37 = vpop.eup %2582  ;;  %v850_v38 = vsel %vm167_vm3, %v2581_v36, 0.0 }
 0x561   :  { %v853_v39 = vsel %vm167_vm3, %v2583_v37, 0.0  ;;  %851 = vadd.xlane.f32.xlu1 %v850_v38  ;;  %2584 = vpow2.f32 %v848_v44 }
 0x562   :  { %854 = vadd.xlane.f32.xlu0 %v853_v39  ;;  %2586 = vpow2.f32 %v846_v45 }
 0x56b   :  { %v2585_v46 = vpop.eup %2584 }
 0x56c   :  { %v2587_v47 = vpop.eup %2586  ;;  %v859_v48 = vsel %vm167_vm3, %v2585_v46, 0.0 }
 0x56d   :  { %v856_v49 = vsel %vm167_vm3, %v2587_v47, 0.0 }
 0x572   :  { %986 = vrot.lane.b32.xlu1 %v2860_v19, %s2758_s7 }
 0x576   :  { %1034 = vrot.lane.b32.xlu1 %v2866_v24, %s2758_s7 }
 0x578   :  { %938 = vrot.lane.b32.xlu0 %v2868_v25, %s2758_s7 }
 0x597   :  { %860 = vadd.xlane.f32.xlu0 %v859_v48 }
 0x59a   :  { %857 = vadd.xlane.f32.xlu1 %v856_v49 }
 0x5ab   :  { %1165 = vrot.lane.b32.xlu1 %v2868_v25, %s2759_s15 }
 0x5ad   :  { %1114 = vrot.lane.b32.xlu0 %v2862_v21, %s2759_s15 }
 0x5af   :  { %1163 = vrot.lane.b32.xlu1 %v2868_v25, %s2760_s16 }
 0x5b1   :  { %1112 = vrot.lane.b32.xlu0 %v2862_v21, %s2760_s16 }
 0x5b3   :  { %1267 = vrot.lane.b32.xlu1 %v2866_v24, %s2759_s15 }
 0x5b5   :  { %1216 = vrot.lane.b32.xlu0 %v2860_v19, %s2759_s15 }
 0x5b7   :  { %1265 = vrot.lane.b32.xlu1 %v2866_v24, %s2760_s16 }
 0x5b9   :  { %1214 = vrot.lane.b32.xlu0 %v2860_v19, %s2760_s16 }
 0x5ee   :  { %v852_v50 = vpop.xlane.xlu1 %851 }
 0x5ef   :  { %2588 = vrcp.f32 %v852_v50  ;;  %v855_v51 = vpop.xlane.xlu0 %854 }
 0x5f0   :  { %2590 = vrcp.f32 %v855_v51 }
 0x5f2   :  { %v987_v54 = vpop.permute.xlu1 %986 }
 0x5f3   :  { %v939_v52 = vpop.permute.xlu0 %938  ;;  %v992_v2 = vsel %vm422_vm4, %v987_v54, 0 }
 0x5f4   :  { %v944_v53 = vsel %vm422_vm4, %v939_v52, 0 }
 0x5f5   :  { %2416 = vmatpush3.bf16.msra.mxu0 %v944_v53 }
 0x5f6   :  { %2427 = vmatprep.subr.bf16.mxu0 %v2753_v12  ;;  %v1035_v62 = vpop.permute.xlu1 %1034 }
 0x5f7   :  { %v1040_v3 = vsel %vm422_vm4, %v1035_v62, 0 }
 0x5f9   :  { %v2589_v55 = vpop.eup %2588 }
 0x5fa   :  { %v2591_v56 = vpop.eup %2590  ;;  %v870_v57 = vmul.f32 %v2589_v55, %v2581_v36 }
 0x5fb   :  { %v871_v59 = vmul.f32 %v2591_v56, %v2583_v37 }
 0x5fc   :  { %v878_v60 = vadd.f32 %v874_v58, %v870_v57  ;;  %v886_v63 = vpack.c.bf16 %v870_v57, %v870_v57 }
 0x5fd   :  { %v879_v0 = vadd.f32 %v875_v61, %v871_v59  ;;  %v887_v1 = vpack.c.bf16 %v871_v59, %v871_v59 }
 0x5fe   :  { %882 = vst.msk [vmem:[#allocation11] sm:$0xff] %vm167_vm3, %v878_v60  ;;  %2412 = vmatmul.mubr.msk.bf16.vlgmr.msra.gmra.mrb[24].mxu1 %vm167_vm3, %v886_v63 }
 0x5ff   :  { %883 = vst.msk [vmem:[#allocation11 + $0x8] sm:$0xff] %vm167_vm3, %v879_v0  ;;  %2418 = vmatmul.mubr.msk.bf16.vlgmr.msra.gmra.mrb[28].mxu0 %vm167_vm3, %v887_v1  ;;  %2422 = vmatpush3.bf16.msra.mxu1 %v992_v2 }
 0x600   :  { %2428 = vmatpush3.bf16.msra.mxu0 %v1040_v3  ;;  %2429 = vmatprep.mubr.msk.bf16.mxu0 %vm2754_vm2, %v2753_v12 }
 0x601   :  { %2439 = vmatprep.subr.bf16.mxu0 %v2753_v12  ;;  %2423 = vmatprep.mubr.msk.bf16.mxu1 %vm2754_vm2, %v2753_v12 }
 0x602   :  { %2433 = vmatprep.subr.bf16.mxu1 %v2753_v12 }
 0x624   :  { %v861_v4 = vpop.xlane.xlu0 %860 }
 0x625   :  { %2592 = vrcp.f32 %v861_v4 }
 0x627   :  { %v858_v5 = vpop.xlane.xlu1 %857 }
 0x628   :  { %2594 = vrcp.f32 %v858_v5  ;;  %v1115_v9 = vpop.permute.xlu0 %1114 }
 0x629   :  { %v1120_v26 = vsel %vm167_vm3, %v1115_v9, 0 }
 0x62b   :  { %v1166_v6 = vpop.permute.xlu1 %1165 }
 0x62c   :  { %v1171_v18 = vsel %vm167_vm3, %v1166_v6, 0  ;;  %v1113_v23 = vpop.permute.xlu0 %1112 }
 0x62f   :  { %v2593_v7 = vpop.eup %2592  ;;  %v1164_v16 = vpop.permute.xlu1 %1163 }
 0x630   :  { %v873_v8 = vmul.f32 %v2593_v7, %v2585_v46  ;;  %v1217_v28 = vpop.permute.xlu0 %1216 }
 0x631   :  { %v1222_v30 = vsel %vm167_vm3, %v1217_v28, 0 }
 0x632   :  { %v2595_v11 = vpop.eup %2594  ;;  %v881_v13 = vadd.f32 %v877_v10, %v873_v8  ;;  %v889_v14 = vpack.c.bf16 %v873_v8, %v873_v8 }
 0x633   :  { %v872_v15 = vmul.f32 %v2595_v11, %v2587_v47  ;;  %v1268_v27 = vpop.permute.xlu1 %1267 }
 0x634   :  { %885 = vst.msk [vmem:[#allocation11 + $0x18] sm:$0xff] %vm167_vm3, %v881_v13  ;;  %2430 = vmatmul.mubr.msk.bf16.vlgmr.msra.gmra.mrb[32].mxu0 %vm167_vm3, %v889_v14  ;;  %v1273_v29 = vsel %vm167_vm3, %v1268_v27, 0  ;;  %v1215_v32 = vpop.permute.xlu0 %1214 }
 0x635   :  { %v880_v20 = vadd.f32 %v876_v17, %v872_v15  ;;  %2440 = vmatpush3.bf16.xpose.msra.mxu0 %v1171_v18  ;;  %v888_v22 = vpack.c.bf16 %v872_v15, %v872_v15  ;;  %2441 = vmatprep.mubr.msk.bf16.mxu0 %vm2754_vm2, %v2753_v12 }
 0x636   :  { %2451 = vmatprep.subr.bf16.mxu0 %v2753_v12 }
 0x637   :  { %884 = vst.msk [vmem:[#allocation11 + $0x10] sm:$0xff] %vm167_vm3, %v880_v20  ;;  %2424 = vmatmul.mubr.msk.bf16.vlgmr.msra.gmra.mrb[28].mxu1 %vm167_vm3, %v888_v22  ;;  %v1266_v31 = vpop.permute.xlu1 %1265 }
 0x638   :  { %2434 = vmatpush3.bf16.xpose.msra.mxu1 %v1120_v26  ;;  %2435 = vmatprep.mubr.msk.bf16.mxu1 %vm2754_vm2, %v2753_v12 }
 0x639   :  { %2445 = vmatprep.subr.bf16.mxu1 %v2753_v12 }
 0x63c   :  { %2442 = vmatmul.mubr.msk.bf16.vlgmr.msra.gmra.mrb[36].mxu0 %vm167_vm3, %v1164_v16 }
 0x63d   :  { %2452 = vmatpush3.bf16.xpose.msra.mxu0 %v1273_v29  ;;  %2453 = vmatprep.mubr.msk.bf16.mxu0 %vm2754_vm2, %v2753_v12 }
 0x63e   :  { %2463 = vmatprep.subr.bf16.mxu0 %v2753_v12 }
 0x63f   :  { %2436 = vmatmul.mubr.msk.bf16.vlgmr.msra.gmra.mrb[32].mxu1 %vm167_vm3, %v1113_v23 }
 0x640   :  { %2446 = vmatpush3.bf16.xpose.msra.mxu1 %v1222_v30  ;;  %2447 = vmatprep.mubr.msk.bf16.mxu1 %vm2754_vm2, %v2753_v12 }
 0x641   :  { %2457 = vmatprep.subr.bf16.mxu1 %v2753_v12 }
 0x644   :  { %2454 = vmatmul.mubr.msk.bf16.vlgmr.msra.gmra.mrb[40].mxu0 %vm167_vm3, %v1266_v31 }
 0x645   :  { %2465 = vmatprep.mubr.msk.bf16.mxu0 %vm2754_vm2, %v2753_v12 }
 0x647   :  { %2448 = vmatmul.mubr.msk.bf16.vlgmr.msra.gmra.mrb[36].mxu1 %vm167_vm3, %v1215_v32 }
 0x648   :  { %2459 = vmatprep.mubr.msk.bf16.mxu1 %vm2754_vm2, %v2753_v12 }
 0x6d1   :  { %v3032_v33 = vpop.f32.mrb[24].mxu1 }
 0x6d2   :  { %v3034_v34 = vpop.f32.mrb[28].mxu0  ;;  %v2413_v35 = vpop.f32.mrb[25].mxu1 }
 0x6d3   :  { %v2419_v36 = vpop.f32.mrb[29].mxu0  ;;  %v935_v37 = vpop.f32.mrb[26].mxu1 }
 0x6d4   :  { %v983_v38 = vpop.f32.mrb[30].mxu0  ;;  %v2414_v39 = vpop.f32.mrb[27].mxu1 }
 0x6d5   :  { %v2420_v40 = vpop.f32.mrb[31].mxu0 }
 0x707   :  { %v3036_v41 = vpop.f32.mrb[32].mxu0 }
 0x708   :  { %v2431_v42 = vpop.f32.mrb[33].mxu0 }
 0x709   :  { %v1079_v43 = vpop.f32.mrb[34].mxu0  ;;  %v1364_v42 = vld [vmem:[#allocation11 + $0x8] sm:$0xff] }
 0x70a   :  { %v2432_v44 = vpop.f32.mrb[35].mxu0  ;;  %v3038_v45 = vpop.f32.mrb[28].mxu1 }
 0x70b   :  { %v2425_v46 = vpop.f32.mrb[29].mxu1 }
 0x70c   :  { %v1031_v47 = vpop.f32.mrb[30].mxu1 }
 0x70d   :  { %v2426_v48 = vpop.f32.mrb[31].mxu1 }
 0x70f   :  { %v1207_v49 = vpop.f32.mrb[36].mxu0 }
 0x710   :  { %v2443_v50 = vpop.f32.mrb[37].mxu0  ;;  %v1318_v51 = vsel %vm167_vm3, %v1207_v49, -inf }
 0x711   :  { %1319 = vmax.xlane.f32.xlu1 %v1318_v51  ;;  %v1210_v52 = vpop.f32.mrb[38].mxu0 }
 0x712   :  { %v2444_v53 = vpop.f32.mrb[39].mxu0  ;;  %v1156_v54 = vpop.f32.mrb[32].mxu1 }
 0x713   :  { %v2437_v55 = vpop.f32.mrb[33].mxu1  ;;  %v1315_v56 = vsel %vm167_vm3, %v1156_v54, -inf }
 0x714   :  { %1316 = vmax.xlane.f32.xlu0 %v1315_v56  ;;  %v1159_v57 = vpop.f32.mrb[34].mxu1 }
 0x715   :  { %v2438_v58 = vpop.f32.mrb[35].mxu1 }
 0x717   :  { %v1309_v59 = vpop.f32.mrb[40].mxu0 }
 0x718   :  { %v2455_v60 = vpop.f32.mrb[41].mxu0  ;;  %v1324_v4 = vsel %vm167_vm3, %v1309_v59, -inf }
 0x719   :  { %v1312_v61 = vpop.f32.mrb[42].mxu0 }
 0x71a   :  { %v2456_v62 = vpop.f32.mrb[43].mxu0  ;;  %v1258_v63 = vpop.f32.mrb[36].mxu1 }
 0x71b   :  { %v2449_v0 = vpop.f32.mrb[37].mxu1  ;;  %v1321_v1 = vsel %vm167_vm3, %v1258_v63, -inf }
 0x71c   :  { %1322 = vmax.xlane.f32.xlu0 %v1321_v1  ;;  %v1261_v2 = vpop.f32.mrb[38].mxu1 }
 0x71d   :  { %v2450_v3 = vpop.f32.mrb[39].mxu1 }
 0x71e   :  { %v1365_v3 = vld [vmem:[#allocation11 + $0x10] sm:$0xff] }
 0x720   :  { %1325 = vmax.xlane.f32.xlu0 %v1324_v4 }
 0x722   :  { %1379 = vrot.lane.b32.xlu1 %v2862_v21, %s2761_s17 }
 0x79e   :  { %v1320_v5 = vpop.xlane.xlu1 %1319 }
 0x79f   :  { %v1328_v6 = vsub.f32 %v1207_v49, %v1320_v5  ;;  %v1363_v49 = vld [vmem:[#allocation11] sm:$0xff] }
 0x7a1   :  { %v1333_v7 = vmul.f32 1.442695, %v1328_v6  ;;  %v1317_v8 = vpop.xlane.xlu0 %1316 }
 0x7a2   :  { %v1380_v9 = vpop.permute.xlu1 %1379  ;;  %v1327_v10 = vsub.f32 %v1156_v54, %v1317_v8 }
 0x7a3   :  { %2596 = vpow2.f32 %v1333_v7  ;;  %v1385_v11 = vsel %vm422_vm4, %v1380_v9, 0 }
 0x7a4   :  { %v1331_v13 = vmul.f32 1.442695, %v1327_v10  ;;  %2458 = vmatpush3.bf16.msra.mxu1 %v1385_v11 }
 0x7a5   :  { %2469 = vmatprep.subr.bf16.mxu1 %v2753_v12 }
 0x7a6   :  { %2598 = vpow2.f32 %v1331_v13 }
 0x7a9   :  { %v1323_v18 = vpop.xlane.xlu0 %1322 }
 0x7aa   :  { %v1329_v26 = vsub.f32 %v1258_v63, %v1323_v18 }
 0x7ac   :  { %v1335_v27 = vmul.f32 1.442695, %v1329_v26 }
 0x7ad   :  { %v2597_v14 = vpop.eup %2596  ;;  %v1326_v20 = vpop.xlane.xlu0 %1325 }
 0x7ae   :  { %v1342_v15 = vsel %vm167_vm3, %v2597_v14, 0.0  ;;  %v1330_v22 = vsub.f32 %v1309_v59, %v1326_v20  ;;  %v1366_v59 = vld [vmem:[#allocation11 + $0x18] sm:$0xff] }
 0x7af   :  { %1343 = vadd.xlane.f32.xlu0 %v1342_v15 }
 0x7b0   :  { %v2599_v16 = vpop.eup %2598  ;;  %v1337_v23 = vmul.f32 1.442695, %v1330_v22 }
 0x7b1   :  { %v1339_v17 = vsel %vm167_vm3, %v2599_v16, 0.0 }
 0x7b2   :  { %1340 = vadd.xlane.f32.xlu1 %v1339_v17  ;;  %2600 = vpow2.f32 %v1337_v23 }
 0x7b3   :  { %2602 = vpow2.f32 %v1335_v27 }
 0x7bc   :  { %v2601_v28 = vpop.eup %2600 }
 0x7bd   :  { %v1348_v29 = vsel %vm167_vm3, %v2601_v28, 0.0  ;;  %v3053_v30 = vpop.eup %2602 }
 0x7be   :  { %v1345_v31 = vsel %vm167_vm3, %v3053_v30, 0.0 }
 0x7c3   :  { %1475 = vrot.lane.b32.xlu1 %v2860_v19, %s2761_s17 }
 0x7c5   :  { %1427 = vrot.lane.b32.xlu0 %v2868_v25, %s2761_s17 }
 0x7c7   :  { %1523 = vrot.lane.b32.xlu1 %v2866_v24, %s2761_s17 }
 0x7e4   :  { %1349 = vadd.xlane.f32.xlu0 %v1348_v29 }
 0x7eb   :  { %1346 = vadd.xlane.f32.xlu1 %v1345_v31 }
 0x7fa   :  { %1603 = vrot.lane.b32.xlu0 %v2862_v21, %s2762_s18 }
 0x7fc   :  { %1654 = vrot.lane.b32.xlu1 %v2868_v25, %s2762_s18 }
 0x7fe   :  { %1601 = vrot.lane.b32.xlu0 %v2862_v21, %s2763_s19 }
 0x800   :  { %1652 = vrot.lane.b32.xlu1 %v2868_v25, %s2763_s19 }
 0x802   :  { %1705 = vrot.lane.b32.xlu0 %v2860_v19, %s2762_s18 }
 0x804   :  { %1756 = vrot.lane.b32.xlu1 %v2866_v24, %s2762_s18 }
 0x806   :  { %1703 = vrot.lane.b32.xlu0 %v2860_v19, %s2763_s19 }
 0x808   :  { %1754 = vrot.lane.b32.xlu1 %v2866_v24, %s2763_s19 }
 0x83c   :  { %v1344_v32 = vpop.xlane.xlu0 %1343 }
 0x83d   :  { %2604 = vrcp.f32 %v1344_v32 }
 0x83f   :  { %v1341_v35 = vpop.xlane.xlu1 %1340 }
 0x840   :  { %2606 = vrcp.f32 %v1341_v35  ;;  %v1428_v36 = vpop.permute.xlu0 %1427 }
 0x841   :  { %v1433_v37 = vsel %vm422_vm4, %v1428_v36, 0 }
 0x842   :  { %2464 = vmatpush3.bf16.msra.mxu0 %v1433_v37 }
 0x843   :  { %v1476_v38 = vpop.permute.xlu1 %1475  ;;  %2475 = vmatprep.subr.bf16.mxu0 %v2753_v12 }
 0x844   :  { %v1481_v53 = vsel %vm422_vm4, %v1476_v38, 0 }
 0x847   :  { %v2605_v39 = vpop.eup %2604  ;;  %v1524_v43 = vpop.permute.xlu1 %1523 }
 0x848   :  { %v1360_v40 = vmul.f32 %v2605_v39, %v2597_v14  ;;  %v1529_v50 = vsel %vm422_vm4, %v1524_v43, 0 }
 0x84a   :  { %v2607_v44 = vpop.eup %2606  ;;  %v1368_v46 = vadd.f32 %v1364_v42, %v1360_v40  ;;  %v1376_v47 = vpack.c.bf16 %v1360_v40, %v1360_v40 }
 0x84b   :  { %v1359_v48 = vmul.f32 %v2607_v44, %v2599_v16 }
 0x84c   :  { %1372 = vst.msk [vmem:[#allocation11 + $0x8] sm:$0xff] %vm167_vm3, %v1368_v46  ;;  %2466 = vmatmul.mubr.msk.bf16.vlgmr.msra.gmra.mrb[44].mxu0 %vm167_vm3, %v1376_v47 }
 0x84d   :  { %v1367_v51 = vadd.f32 %v1363_v49, %v1359_v48  ;;  %2476 = vmatpush3.bf16.msra.mxu0 %v1529_v50  ;;  %v1375_v52 = vpack.c.bf16 %v1359_v48, %v1359_v48  ;;  %2477 = vmatprep.mubr.msk.bf16.mxu0 %vm2754_vm2, %v2753_v12 }
 0x84e   :  { %2487 = vmatprep.subr.bf16.mxu0 %v2753_v12 }
 0x84f   :  { %1371 = vst.msk [vmem:[#allocation11] sm:$0xff] %vm167_vm3, %v1367_v51  ;;  %2460 = vmatmul.mubr.msk.bf16.vlgmr.msra.gmra.mrb[40].mxu1 %vm167_vm3, %v1375_v52 }
 0x850   :  { %2470 = vmatpush3.bf16.msra.mxu1 %v1481_v53  ;;  %2471 = vmatprep.mubr.msk.bf16.mxu1 %vm2754_vm2, %v2753_v12 }
 0x851   :  { %2481 = vmatprep.subr.bf16.mxu1 %v2753_v12 }
 0x871   :  { %v1350_v54 = vpop.xlane.xlu0 %1349 }
 0x872   :  { %2608 = vrcp.f32 %v1350_v54 }
 0x875   :  { %v1604_v63 = vpop.permute.xlu0 %1603 }
 0x876   :  { %v1609_v8 = vsel %vm167_vm3, %v1604_v63, 0 }
 0x878   :  { %v1347_v55 = vpop.xlane.xlu1 %1346 }
 0x879   :  { %2610 = vrcp.f32 %v1347_v55  ;;  %v1602_v7 = vpop.permute.xlu0 %1601 }
 0x87c   :  { %v2609_v56 = vpop.eup %2608  ;;  %v1655_v57 = vpop.permute.xlu1 %1654 }
 0x87d   :  { %v1362_v58 = vmul.f32 %v2609_v56, %v2601_v28  ;;  %v1660_v0 = vsel %vm167_vm3, %v1655_v57, 0  ;;  %v1706_v10 = vpop.permute.xlu0 %1705 }
 0x87e   :  { %v1711_v11 = vsel %vm167_vm3, %v1706_v10, 0 }
 0x87f   :  { %v1370_v60 = vadd.f32 %v1366_v59, %v1362_v58  ;;  %v1378_v61 = vpack.c.bf16 %v1362_v58, %v1362_v58 }
 0x880   :  { %v1653_v62 = vpop.permute.xlu1 %1652 }
 0x881   :  { %1374 = vst.msk [vmem:[#allocation11 + $0x18] sm:$0xff] %vm167_vm3, %v1370_v60  ;;  %2478 = vmatmul.mubr.msk.bf16.vlgmr.msra.gmra.mrb[48].mxu0 %vm167_vm3, %v1378_v61  ;;  %v1704_v14 = vpop.permute.xlu0 %1703 }
 0x882   :  { %2488 = vmatpush3.bf16.xpose.msra.mxu0 %v1660_v0  ;;  %2489 = vmatprep.mubr.msk.bf16.mxu0 %vm2754_vm2, %v2753_v12 }
 0x883   :  { %v2611_v1 = vpop.eup %2610  ;;  %2499 = vmatprep.subr.bf16.mxu0 %v2753_v12 }
 0x884   :  { %v1361_v2 = vmul.f32 %v2611_v1, %v3053_v30  ;;  %v1757_v5 = vpop.permute.xlu1 %1756 }
 0x885   :  { %v1762_v9 = vsel %vm167_vm3, %v1757_v5, 0 }
 0x886   :  { %v1369_v4 = vadd.f32 %v1365_v3, %v1361_v2  ;;  %v1377_v6 = vpack.c.bf16 %v1361_v2, %v1361_v2 }
 0x888   :  { %1373 = vst.msk [vmem:[#allocation11 + $0x10] sm:$0xff] %vm167_vm3, %v1369_v4  ;;  %2472 = vmatmul.mubr.msk.bf16.vlgmr.msra.gmra.mrb[44].mxu1 %vm167_vm3, %v1377_v6  ;;  %v1755_v13 = vpop.permute.xlu1 %1754 }
 0x889   :  { %2482 = vmatpush3.bf16.xpose.msra.mxu1 %v1609_v8  ;;  %2490 = vmatmul.mubr.msk.bf16.vlgmr.msra.gmra.mrb[52].mxu0 %vm167_vm3, %v1653_v62 }
 0x88a   :  { %2500 = vmatpush3.bf16.xpose.msra.mxu0 %v1762_v9  ;;  %2483 = vmatprep.mubr.msk.bf16.mxu1 %vm2754_vm2, %v2753_v12 }
 0x88b   :  { %2493 = vmatprep.subr.bf16.mxu1 %v2753_v12  ;;  %2501 = vmatprep.mubr.msk.bf16.mxu0 %vm2754_vm2, %v2753_v12 }
 0x88c   :  { %2511 = vmatprep.subr.bf16.mxu0 %v2753_v12 }
 0x890   :  { %2484 = vmatmul.mubr.msk.bf16.vlgmr.msra.gmra.mrb[48].mxu1 %vm167_vm3, %v1602_v7 }
 0x891   :  { %2494 = vmatpush3.bf16.xpose.msra.mxu1 %v1711_v11  ;;  %2502 = vmatmul.mubr.msk.bf16.vlgmr.msra.gmra.mrb[56].mxu0 %vm167_vm3, %v1755_v13 }
 0x892   :  { %2495 = vmatprep.mubr.msk.bf16.mxu1 %vm2754_vm2, %v2753_v12  ;;  %2505 = vmatprep.subr.bf16.mxu1 %v2753_v12 }
 0x893   :  { %2513 = vmatprep.mubr.msk.bf16.mxu0 %vm2754_vm2, %v2753_v12 }
 0x898   :  { %2496 = vmatmul.mubr.msk.bf16.vlgmr.msra.gmra.mrb[52].mxu1 %vm167_vm3, %v1704_v14 }
 0x899   :  { %2507 = vmatprep.mubr.msk.bf16.mxu1 %vm2754_vm2, %v2753_v12 }
 0x91f   :  { %v3108_v15 = vpop.f32.mrb[44].mxu0 }
 0x920   :  { %v2467_v16 = vpop.f32.mrb[45].mxu0 }
 0x921   :  { %v1472_v17 = vpop.f32.mrb[46].mxu0 }
 0x922   :  { %v2468_v18 = vpop.f32.mrb[47].mxu0  ;;  %v3110_v20 = vpop.f32.mrb[40].mxu1 }
 0x923   :  { %v2461_v22 = vpop.f32.mrb[41].mxu1 }
 0x924   :  { %v1424_v23 = vpop.f32.mrb[42].mxu1 }
 0x925   :  { %v2462_v26 = vpop.f32.mrb[43].mxu1 }
 0x926   :  { %v1852_v26 = vld [vmem:[#allocation11] sm:$0xff] }
 0x954   :  { %v3112_v27 = vpop.f32.mrb[48].mxu0 }
 0x955   :  { %v2479_v28 = vpop.f32.mrb[49].mxu0 }
 0x956   :  { %v1568_v29 = vpop.f32.mrb[50].mxu0 }
 0x957   :  { %v2480_v30 = vpop.f32.mrb[51].mxu0 }
 0x95b   :  { %v3114_v31 = vpop.f32.mrb[44].mxu1 }
 0x95c   :  { %v1696_v32 = vpop.f32.mrb[52].mxu0  ;;  %v2473_v35 = vpop.f32.mrb[45].mxu1 }
 0x95d   :  { %v2491_v36 = vpop.f32.mrb[53].mxu0  ;;  %v1520_v37 = vpop.f32.mrb[46].mxu1  ;;  %v1807_v38 = vsel %vm167_vm3, %v1696_v32, -inf }
 0x95e   :  { %1808 = vmax.xlane.f32.xlu1 %v1807_v38  ;;  %v1699_v39 = vpop.f32.mrb[54].mxu0  ;;  %v2474_v40 = vpop.f32.mrb[47].mxu1 }
 0x95f   :  { %v2492_v42 = vpop.f32.mrb[55].mxu0 }
 0x960   :  { %v1854_v42 = vld [vmem:[#allocation11 + $0x10] sm:$0xff] }
 0x963   :  { %v1645_v43 = vpop.f32.mrb[48].mxu1 }
 0x964   :  { %v1798_v44 = vpop.f32.mrb[56].mxu0  ;;  %v2485_v46 = vpop.f32.mrb[49].mxu1  ;;  %v1804_v47 = vsel %vm167_vm3, %v1645_v43, -inf }
 0x965   :  { %v2503_v48 = vpop.f32.mrb[57].mxu0  ;;  %1805 = vmax.xlane.f32.xlu0 %v1804_v47  ;;  %v1648_v49 = vpop.f32.mrb[50].mxu1  ;;  %v1813_v58 = vsel %vm167_vm3, %v1798_v44, -inf }
 0x966   :  { %v1801_v50 = vpop.f32.mrb[58].mxu0  ;;  %v2486_v51 = vpop.f32.mrb[51].mxu1 }
 0x967   :  { %v2504_v52 = vpop.f32.mrb[59].mxu0 }
 0x96b   :  { %v1747_v53 = vpop.f32.mrb[52].mxu1 }
 0x96c   :  { %v2497_v54 = vpop.f32.mrb[53].mxu1  ;;  %v1810_v55 = vsel %vm167_vm3, %v1747_v53, -inf }
 0x96d   :  { %1811 = vmax.xlane.f32.xlu0 %v1810_v55  ;;  %v1750_v56 = vpop.f32.mrb[54].mxu1 }
 0x96e   :  { %v2498_v57 = vpop.f32.mrb[55].mxu1 }
 0x96f   :  { %1868 = vrot.lane.b32.xlu1 %v2862_v21, %s2764_s20 }
 0x971   :  { %1814 = vmax.xlane.f32.xlu0 %v1813_v58 }
 0x9eb   :  { %v1809_v59 = vpop.xlane.xlu1 %1808 }
 0x9ec   :  { %v1817_v60 = vsub.f32 %v1696_v32, %v1809_v59 }
 0x9ee   :  { %v1822_v61 = vmul.f32 1.442695, %v1817_v60 }
 0x9ef   :  { %v1869_v62 = vpop.permute.xlu1 %1868 }
 0x9f0   :  { %2612 = vpow2.f32 %v1822_v61  ;;  %v1874_v63 = vsel %vm422_vm4, %v1869_v62, 0 }
 0x9f1   :  { %2506 = vmatpush3.bf16.msra.mxu1 %v1874_v63 }
 0x9f2   :  { %v1806_v0 = vpop.xlane.xlu0 %1805  ;;  %2517 = vmatprep.subr.bf16.mxu1 %v2753_v12 }
 0x9f3   :  { %v1816_v1 = vsub.f32 %v1645_v43, %v1806_v0 }
 0x9f5   :  { %v1820_v2 = vmul.f32 1.442695, %v1816_v1  ;;  %v2562_v1 = vld [vmem:[#allocation9] sm:$0xff]  }
 0x9f7   :  { %2614 = vpow2.f32 %v1820_v2 }
 0x9fa   :  { %v2613_v3 = vpop.eup %2612  ;;  %v1812_v4 = vpop.xlane.xlu0 %1811 }
 0x9fb   :  { %v1818_v21 = vsub.f32 %v1747_v53, %v1812_v4  ;;  %v1831_v5 = vsel %vm167_vm3, %v2613_v3, 0.0  ;;  %v1855_v53 = vld [vmem:[#allocation11 + $0x18] sm:$0xff] }
 0x9fc   :  { %1832 = vadd.xlane.f32.xlu0 %v1831_v5  ;;  %v2563_v4 = vld [vmem:[#allocation9 + $0x8] sm:$0xff]  }
 0x9fd   :  { %v1824_v6 = vmul.f32 1.442695, %v1818_v21 }
 0x9fe   :  { %v1815_v7 = vpop.xlane.xlu0 %1814 }
 0x9ff   :  { %2616 = vpow2.f32 %v1824_v6  ;;  %v1819_v8 = vsub.f32 %v1798_v44, %v1815_v7 }
 0xa01   :  { %v2615_v9 = vpop.eup %2614  ;;  %v1826_v10 = vmul.f32 1.442695, %v1819_v8 }
 0xa02   :  { %v1828_v11 = vsel %vm167_vm3, %v2615_v9, 0.0 }
 0xa03   :  { %2618 = vpow2.f32 %v1826_v10  ;;  %1829 = vadd.xlane.f32.xlu1 %v1828_v11 }
 0xa09   :  { %v2617_v13 = vpop.eup %2616 }
 0xa0a   :  { %v1834_v14 = vsel %vm167_vm3, %v2617_v13, 0.0 }
 0xa0b   :  { %1835 = vadd.xlane.f32.xlu1 %v1834_v14 }
 0xa0d   :  { %v3127_v16 = vpop.eup %2618 }
 0xa0e   :  { %v1837_v17 = vsel %vm167_vm3, %v3127_v16, 0.0 }
 0xa0f   :  { %1838 = vadd.xlane.f32.xlu0 %v1837_v17 }
 0xa1c   :  { %1964 = vrot.lane.b32.xlu1 %v2860_v19, %s2764_s20 }
 0xa20   :  { %2012 = vrot.lane.b32.xlu1 %v2866_v24, %s2764_s20 }
 0xa24   :  { %1088 = vrot.lane.b32.xlu1 %v3034_v34, %s2751_s21 }
 0xa25   :  { %1916 = vrot.lane.b32.xlu0 %v2868_v25, %s2764_s20 }
 0xa28   :  { %1092 = vrot.lane.b32.xlu1 %v3036_v41, %s2751_s21  ;;  %v1853_v41 = vld [vmem:[#allocation11 + $0x8] sm:$0xff] }
 0xa29   :  { %1086 = vrot.lane.b32.xlu0 %v3032_v33, %s2751_s21 }
 0xa2c   :  { %1577 = vrot.lane.b32.xlu1 %v3108_v15, %s2765_s22 }
 0xa2d   :  { %1090 = vrot.lane.b32.xlu0 %v3038_v45, %s2751_s21 }
 0xa30   :  { %1581 = vrot.lane.b32.xlu1 %v3112_v27, %s2765_s22 }
 0xa31   :  { %1575 = vrot.lane.b32.xlu0 %v3110_v20, %s2765_s22 }
 0xa35   :  { %1579 = vrot.lane.b32.xlu0 %v3114_v31, %s2765_s22 }
 0xa89   :  { %v1833_v19 = vpop.xlane.xlu0 %1832 }
 0xa8a   :  { %2620 = vrcp.f32 %v1833_v19 }
 0xa90   :  { %v1830_v24 = vpop.xlane.xlu1 %1829 }
 0xa91   :  { %2622 = vrcp.f32 %v1830_v24 }
 0xa94   :  { %v2621_v25 = vpop.eup %2620 }
 0xa95   :  { %v1849_v34 = vmul.f32 %v2621_v25, %v2613_v3 }
 0xa97   :  { %v1857_v33 = vadd.f32 %v1853_v41, %v1849_v34  ;;  %v1865_v37 = vpack.c.bf16 %v1849_v34, %v1849_v34 }
 0xa98   :  { %v1836_v18 = vpop.xlane.xlu1 %1835 }
 0xa99   :  { %1861 = vst.msk [vmem:[#allocation11 + $0x8] sm:$0xff] %vm167_vm3, %v1857_v33  ;;  %2624 = vrcp.f32 %v1836_v18 }
 0xa9b   :  { %v2623_v15 = vpop.eup %2622 }
 0xa9c   :  { %v1848_v45 = vmul.f32 %v2623_v15, %v2615_v9  ;;  %v1965_v22 = vpop.permute.xlu1 %1964  ;;  %v1839_v23 = vpop.xlane.xlu0 %1838 }
 0xa9d   :  { %2626 = vrcp.f32 %v1839_v23  ;;  %v1970_v28 = vsel %vm422_vm4, %v1965_v22, 0 }
 0xa9e   :  { %v1856_v20 = vadd.f32 %v1852_v26, %v1848_v45  ;;  %v1864_v27 = vpack.c.bf16 %v1848_v45, %v1848_v45 }
 0xaa0   :  { %1860 = vst.msk [vmem:[#allocation11] sm:$0xff] %vm167_vm3, %v1856_v20  ;;  %2508 = vmatmul.mubr.msk.bf16.vlgmr.msra.gmra.mrb[56].mxu1 %vm167_vm3, %v1864_v27  ;;  %v2013_v29 = vpop.permute.xlu1 %2012  ;;  %v1917_v30 = vpop.permute.xlu0 %1916  ;;  %v2082_v31 = vld [vmem:[#allocation11 + $0x8] sm:$0xff] }
 0xaa1   :  { %2518 = vmatpush3.bf16.msra.mxu1 %v1970_v28  ;;  %v1922_v32 = vsel %vm422_vm4, %v1917_v30, 0  ;;  %2519 = vmatprep.mubr.msk.bf16.mxu1 %vm2754_vm2, %v2753_v12  ;;  %v2086_v35 = vmul.f32 0.25, %v2082_v31  ;;  %v2018_v43 = vsel %vm422_vm4, %v2013_v29, 0 }
 0xaa2   :  { %2512 = vmatpush3.bf16.msra.mxu0 %v1922_v32  ;;  %2529 = vmatprep.subr.bf16.mxu1 %v2562_v1 }
 0xaa3   :  { %v2625_v36 = vpop.eup %2624  ;;  %2523 = vmatprep.subr.bf16.mxu0 %v2753_v12  ;;  %2090 = vst.msk [vmem:[#allocation11 + $0x8] sm:$0xff] %vm167_vm3, %v2086_v35 }
 0xaa4   :  { %v1850_v38 = vmul.f32 %v2625_v36, %v2617_v13  ;;  %v1089_v39 = vpop.permute.xlu1 %1088  ;;  %v1087_v40 = vpop.permute.xlu0 %1086 }
 0xaa5   :  { %1100 = vst.msk [vmem:[#allocation3 + $0x8] sm:$0xff] %vm1098_vm5, %v1089_v39  ;;  %1099 = vst.msk [vmem:[#allocation3] sm:$0xff] %vm1098_vm5, %v1087_v40  ;;  %2514 = vmatmul.mubr.msk.bf16.vlgmr.msra.gmra.mrb[60].mxu0 %vm167_vm3, %v1865_v37 }
 0xaa6   :  { %v1858_v44 = vadd.f32 %v1854_v42, %v1850_v38  ;;  %2524 = vmatpush3.bf16.msra.mxu0 %v2018_v43  ;;  %v1866_v46 = vpack.c.bf16 %v1850_v38, %v1850_v38  ;;  %2525 = vmatprep.mubr.msk.bf16.mxu0 %vm2754_vm2, %v2753_v12 }
 0xaa7   :  { %v2627_v47 = vpop.eup %2626  ;;  %v2081_v48 = vld [vmem:[#allocation11] sm:$0xff] }
 0xaa8   :  { %1862 = vst.msk [vmem:[#allocation11 + $0x10] sm:$0xff] %vm167_vm3, %v1858_v44  ;;  %v1851_v49 = vmul.f32 %v2627_v47, %v3127_v16  ;;  %2520 = vmatmul.mubr.msk.bf16.vlgmr.msra.gmra.mrb[60].mxu1 %vm167_vm3, %v1866_v46  ;;  %v1093_v50 = vpop.permute.xlu1 %1092  ;;  %v1091_v51 = vpop.permute.xlu0 %1090  ;;  %v2085_v52 = vmul.f32 0.25, %v2081_v48 }
 0xaa9   :  { %1102 = vst.msk [vmem:[#allocation3 + $0x18] sm:$0xff] %vm1098_vm5, %v1093_v50  ;;  %1101 = vst.msk [vmem:[#allocation3 + $0x10] sm:$0xff] %vm1098_vm5, %v1091_v51  ;;  %2530 = vmatpush3.bf16.msra.mxu1 %v2562_v1 }
 0xaaa   :  { %v1859_v54 = vadd.f32 %v1855_v53, %v1851_v49  ;;  %v1867_v55 = vpack.c.bf16 %v1851_v49, %v1851_v49  ;;  %2089 = vst.msk [vmem:[#allocation11] sm:$0xff] %vm167_vm3, %v2085_v52  ;;  %2531 = vmatprep.subr.bf16.mxu1 %v2563_v4 }
 0xaac   :  { %1863 = vst.msk [vmem:[#allocation11 + $0x18] sm:$0xff] %vm167_vm3, %v1859_v54  ;;  %v1578_v12 = vpop.permute.xlu1 %1577  ;;  %v1576_v56 = vpop.permute.xlu0 %1575 }
 0xaad   :  { %1589 = vst.msk [vmem:[#allocation3 + $0x8] sm:$0xff] %vm1587_vm6, %v1578_v12  ;;  %1588 = vst.msk [vmem:[#allocation3] sm:$0xff] %vm1587_vm6, %v1576_v56  ;;  %2526 = vmatmul.mubr.msk.bf16.vlgmr.msra.gmra.mrb[64].mxu0 %vm167_vm3, %v1867_v55  ;;  %2532 = vmatpush3.bf16.msra.mxu1 %v2563_v4 }
 0xaaf   :  { %v2083_v57 = vld [vmem:[#allocation11 + $0x10] sm:$0xff] }
 0xab0   :  { %v1582_v58 = vpop.permute.xlu1 %1581  ;;  %v1580_v59 = vpop.permute.xlu0 %1579  ;;  %v2087_v60 = vmul.f32 0.25, %v2083_v57 }
 0xab1   :  { %1591 = vst.msk [vmem:[#allocation3 + $0x18] sm:$0xff] %vm1587_vm6, %v1582_v58  ;;  %1590 = vst.msk [vmem:[#allocation3 + $0x10] sm:$0xff] %vm1587_vm6, %v1580_v59 }
 0xab2   :  { %2091 = vst.msk [vmem:[#allocation11 + $0x10] sm:$0xff] %vm167_vm3, %v2087_v60 }
 0xab3   :  { %v2084_v61 = vld [vmem:[#allocation11 + $0x18] sm:$0xff] }
 0xab4   :  { %v2088_v62 = vmul.f32 0.25, %v2084_v61 }
 0xab6   :  { %2092 = vst.msk [vmem:[#allocation11 + $0x18] sm:$0xff] %vm167_vm3, %v2088_v62 }
 0xb73   :  { %v1910_v63 = vpop.f32.mrb[56].mxu1 }
 0xb74   :  { %v2509_v0 = vpop.f32.mrb[57].mxu1  ;;  %2064 = vrot.lane.b32.xlu0 %v1910_v63, %s2766_s23 }
 0xb75   :  { %v1913_v2 = vpop.f32.mrb[58].mxu1 }
 0xb76   :  { %v2510_v3 = vpop.f32.mrb[59].mxu1 }
 0xb78   :  { %v1958_v21 = vpop.f32.mrb[60].mxu0 }
 0xb79   :  { %2066 = vrot.lane.b32.xlu1 %v1958_v21, %s2766_s23  ;;  %v2515_v5 = vpop.f32.mrb[61].mxu0 }
 0xb7a   :  { %v1961_v6 = vpop.f32.mrb[62].mxu0 }
 0xb7b   :  { %v2516_v7 = vpop.f32.mrb[63].mxu0  ;;  %v2006_v8 = vpop.f32.mrb[60].mxu1 }
 0xb7c   :  { %v2521_v9 = vpop.f32.mrb[61].mxu1  ;;  %2068 = vrot.lane.b32.xlu0 %v2006_v8, %s2766_s23 }
 0xb7d   :  { %v2009_v10 = vpop.f32.mrb[62].mxu1 }
 0xb7e   :  { %v2522_v11 = vpop.f32.mrb[63].mxu1 }
 0xb80   :  { %v2054_v13 = vpop.f32.mrb[64].mxu0 }
 0xb81   :  { %2070 = vrot.lane.b32.xlu1 %v2054_v13, %s2766_s23  ;;  %v2527_v14 = vpop.f32.mrb[65].mxu0 }
 0xb82   :  { %v2057_v16 = vpop.f32.mrb[66].mxu0 }
 0xb83   :  { %v2528_v17 = vpop.f32.mrb[67].mxu0 }
 0xbe6   :  { %v2065_v19 = vpop.permute.xlu0 %2064 }
 0xbe7   :  { %2077 = vst.msk [vmem:[#allocation3] sm:$0xff] %vm2076_vm7, %v2065_v19 }
 0xbeb   :  { %v2067_v24 = vpop.permute.xlu1 %2066 }
 0xbec   :  { %2078 = vst.msk [vmem:[#allocation3 + $0x8] sm:$0xff] %vm2076_vm7, %v2067_v24 }
 0xbee   :  { %v2069_v25 = vpop.permute.xlu0 %2068  ;;  %v2093_v41 = vld [vmem:[#allocation3] sm:$0xff] }
 0xbef   :  { %2079 = vst.msk [vmem:[#allocation3 + $0x10] sm:$0xff] %vm2076_vm7, %v2069_v25 }
 0xbf3   :  { %v2071_v34 = vpop.permute.xlu1 %2070  ;;  %v2094_v33 = vld [vmem:[#allocation3 + $0x8] sm:$0xff] }
 0xbf4   :  { %2080 = vst.msk [vmem:[#allocation3 + $0x18] sm:$0xff] %vm2076_vm7, %v2071_v34  ;;  %v2097_v18 = vpack.c.bf16 %v2094_v33, %v2093_v41 }
 0xbf6   :  { %2533 = vmatprep.mubr.msk.bf16.mxu1 %vm95_vm0, %v2097_v18  ;;  %v2095_v15 = vld [vmem:[#allocation3 + $0x10] sm:$0xff] }
 0xbfb   :  { %v2096_v45 = vld [vmem:[#allocation3 + $0x18] sm:$0xff] }
 0xbfc   :  { %v2098_v22 = vpack.c.bf16 %v2096_v45, %v2095_v15 }
 0xbfe   :  { %2534 = vmatmul.mubr.msk.bf16.vlgmr.msra.gmra.mrb[64].mxu1 %vm95_vm0, %v2098_v22 }
 0xbff   :  { %2705 = shalt.err (!%p2702_p0)
}
 0xc00   :  { %s2706_s29 = scalar_lea.hbm %s3219_s6, 512 }
 0xc01   :  { %p2707_p1 = scmp.ne.s32.totalorder %s3219_s6, %s2706_s29  ;;  %p2710_p2 = scmp.lt.u32.totalorder %s2706_s29, %s3219_s6 }
 0xc03   :  { %p2712_p3 = pnand %p2710_p2, %p2707_p1 }
 0xc05   :  { %2715 = shalt.err (!%p2712_p3)
}
 0xc06   :  { %2204 = dma.vmem_to_hbm [thread:$0]  %s2199_s25, 512, %s3219_s6, [#allocation12], %s2750_s1, %s2750_s1, %s2751_s21  }
 0xc07   :  { %v2252_v23 = vld [vmem:[%s3217_s4] ss:$0 sm:$0xff]  ;;  %s2768_s2 = smov [#allocation10]  }
 0xc08   :  { %s2186_s13 = sshll.u32 %s2768_s2, 4  ;;  %s2187_s13 = int_to_ptr.vmem [resolvable:$true] %s2186_s13 }
 0xc09   :  { %s2716_s4 = scalar_lea.vmem %s2187_s13, 512  ;;  %p2721_p5 = scmp.lt.s32.totalorder %s2187_s13, %s2187_s13 }
 0xc0a   :  { %p2717_p4 = scmp.ne.s32.totalorder %s2187_s13, %s2716_s4  ;;  %p2722_p6 = scmp.lt.s32.totalorder %s2716_s4, %s2716_s4 }
 0xc0c   :  { %p2723_p7 = por %p2722_p6, %p2721_p5 }
 0xc0e   :  { %p2724_p8 = pnand %p2723_p7, %p2717_p4 }
 0xcd1   :  { %v2535_v26 = vpop.f32.mrb[64].mxu1 }
 0xcd2   :  { %v2171_v20 = vadd.f32 %v2535_v26, %v2252_v23  ;;  %v2162_v27 = vpop.f32.mrb[65].mxu1 }
 0xcd3   :  { %v2163_v28 = vadd.f32 %v2252_v23, %v2162_v27  ;;  %v2536_v29 = vpop.f32.mrb[66].mxu1 }
 0xcd4   :  { %2179 = vst.msk [vmem:[#allocation10 + $0x10] sm:$0xff] %vm95_vm0, %v2171_v20  ;;  %v2174_v30 = vadd.f32 %v2536_v29, %v2252_v23  ;;  %v2165_v31 = vpop.f32.mrb[67].mxu1 }
 0xcd5   :  { %2177 = vst.msk [vmem:[#allocation10] sm:$0xff] %vm95_vm0, %v2163_v28  ;;  %v2166_v32 = vadd.f32 %v2252_v23, %v2165_v31 }
 0xcd6   :  { %2180 = vst.msk [vmem:[#allocation10 + $0x18] sm:$0xff] %vm95_vm0, %v2174_v30 }
 0xcd7   :  { %2178 = vst.msk [vmem:[#allocation10 + $0x8] sm:$0xff] %vm95_vm0, %v2166_v32 }
 0xcd8   :  { %2727 = shalt.err (!%p2724_p8)
}
 0xcd9   :  { %s2728_s7 = scalar_lea.hbm %s3218_s5, 512 }
 0xcda   :  { %p2729_p9 = scmp.ne.s32.totalorder %s3218_s5, %s2728_s7  ;;  %p2732_p10 = scmp.lt.u32.totalorder %s2728_s7, %s3218_s5 }
 0xcdc   :  { %p2734_p11 = pnand %p2732_p10, %p2729_p9 }
 0xcde   :  { %2737 = shalt.err (!%p2734_p11)
}
 0xcdf   :  { %2192 = dma.vmem_to_hbm [thread:$0]  %s2187_s13, 512, %s3218_s5, [#allocation6], %s2750_s1, %s2750_s1, %s2751_s21  }
 0xce0   :  { %2742 = dma.done.wait [#allocation6], 512  }
 0xce1   :  { %2743 = vsyncadd [#allocation6], 4294966784 }
 0xce2   :  { %2744 = dma.done.wait [#allocation12], 512  }
 0xce3   :  { %2745 = vsyncadd [#allocation12], 4294966784 }
 0xce4   :  { %2211 = vsyncpa [#allocation5], 1 }
 0xce5   :  { %2212 = vsyncpa [#allocation8], 1 }
 0xce6   :  { %2213 = vsyncpa [#allocation6], 1 }
 0xce7   :  { %2214 = vsyncpa [#allocation12], 1 }

</bundles_post_ra>
